<compile_context>
chip_gen: v5e
topology: v5e:2x2
jax: 0.10.0
libtpu: 0.0.40
codegen_flags: <defaults>
</compile_context>

<pallas_src>
import functools

import jax
import jax.numpy as jnp
from jax.experimental import pallas as pl
from jax.experimental.pallas import tpu as pltpu


PARAM_NAMES = (
    # per-agent transition MLP (MLPEncoder)
    "wt1", "bt1", "wt2", "bt2", "wt3", "bt3",
    # temporal PIA encoder
    "wqt", "bqt", "vt",
    # agent PIA encoder
    "wqa", "bqa", "va",
    # per-agent local encoders (LocalEncoder)
    "wl1", "bl1", "wl2", "bl2", "wl3", "bl3",
    # global_log_std / local_log_std (Mlp with no hidden layers == Linear)
    "wg", "bg", "wll", "bll",
)

# indices into the [8, A*C, A*C] block-diagonal weight stack
_W2, _W3, _WL1, _WL2, _WL3, _WQT, _WQA, _WLL = range(8)


def _round_up(x, m):
    return ((x + m - 1) // m) * m


def init_params(key, *, n_agents, d_in, hidden, context_dim):
    A, H, C = n_agents, hidden, context_dim
    shapes = dict(
        wt1=(A, d_in, H), bt1=(A, 1, H),
        wt2=(A, H, H),    bt2=(A, 1, H),
        wt3=(A, H, C),    bt3=(A, 1, C),
        wqt=(C, C), bqt=(1, C), vt=(1, C),
        wqa=(C, C), bqa=(1, C), va=(1, C),
        wl1=(A, C, H), bl1=(A, 1, H),
        wl2=(A, H, H), bl2=(A, 1, H),
        wl3=(A, H, C), bl3=(A, 1, C),
        wg=(C, C), bg=(1, C),
        wll=(C, C), bll=(1, C),
    )
    keys = jax.random.split(key, len(PARAM_NAMES))
    return {name: 0.1 * jax.random.normal(k, shapes[name], jnp.float32)
            for name, k in zip(PARAM_NAMES, keys)}


def _pack_params(params, *, n_agents, d_in, hidden, context_dim):
    """Pack the 22 parameters into 3 f32 slabs.

    Returns:
      w1_bd   [A*Dp, A*H]    block-diagonal first transition layer (features padded to Dp)
      w_stack [8, A*C, A*C]  block-diagonal W2/W3/WL1/WL2/WL3 + tiled wqt/wqa/wll
      w_misc  [R, A*C]       small matrices + tiled biases, every row offset 8-aligned
      offs    name -> (row_off, n_rows, true_width) with Python-int (static) offsets
      Dp      per-agent padded feature width
    """
    A, H, C = n_agents, hidden, context_dim
    assert H == C, "uniform weight stack requires hidden == context_dim (see TODO)"
    G = A * C
    Dp = _round_up(d_in, 8)
    f32 = jnp.float32

    def bd(blocks):                                   # [A, r, c] -> block-diag [A*r, A*c]
        a_, r, c = blocks.shape
        out = jnp.zeros((a_ * r, a_ * c), f32)
        for a in range(a_):
            out = out.at[a * r:(a + 1) * r, a * c:(a + 1) * c].set(blocks[a].astype(f32))
        return out

    # first transition layer: pad per-agent [d_in, H] -> [Dp, H], then block-diag.
    wt1p = jnp.pad(params["wt1"].astype(f32), ((0, 0), (0, Dp - d_in), (0, 0)))
    w1_bd = bd(wt1p)                                  # [A*Dp, A*H]

    eyeA = jnp.eye(A, dtype=f32)
    w_stack = jnp.stack([
        bd(params["wt2"].astype(f32)),                # _W2
        bd(params["wt3"].astype(f32)),                # _W3
        bd(params["wl1"].astype(f32)),                # _WL1
        bd(params["wl2"].astype(f32)),                # _WL2
        bd(params["wl3"].astype(f32)),                # _WL3
        jnp.kron(eyeA, params["wqt"].astype(f32)),    # _WQT  (shared weight tiled on diag)
        jnp.kron(eyeA, params["wqa"].astype(f32)),    # _WQA
        jnp.kron(eyeA, params["wll"].astype(f32)),    # _WLL
    ])                                                # [8, G, G]

    # small matrices: segment-sum (folds vt/va), lane-expand E, lane-fold F, wg.
    seg_vt = jnp.zeros((G, A), f32)
    seg_va = jnp.zeros((G, A), f32)
    for a in range(A):
        seg_vt = seg_vt.at[a * C:(a + 1) * C, a].set(params["vt"][0].astype(f32))
        seg_va = seg_va.at[a * C:(a + 1) * C, a].set(params["va"][0].astype(f32))
    E = jnp.kron(eyeA, jnp.ones((1, C), f32))         # [A, G]  expand per-agent scalar over C lanes
    F = jnp.tile(jnp.eye(C, dtype=f32), (A, 1))       # [G, C]  sum agent blocks lane-wise

    entries = [
        ("seg_vt", seg_vt), ("seg_va", seg_va), ("E", E), ("F", F),
        ("wg", params["wg"].astype(f32)),
        ("bt1", params["bt1"].astype(f32).reshape(1, A * H)),
        ("bt2", params["bt2"].astype(f32).reshape(1, A * H)),
        ("bt3", params["bt3"].astype(f32).reshape(1, A * C)),
        ("bqt", jnp.tile(params["bqt"].astype(f32), (1, A))),
        ("bqa", jnp.tile(params["bqa"].astype(f32), (1, A))),
        ("bl1", params["bl1"].astype(f32).reshape(1, A * H)),
        ("bl2", params["bl2"].astype(f32).reshape(1, A * H)),
        ("bl3", params["bl3"].astype(f32).reshape(1, A * C)),
        ("bll", jnp.tile(params["bll"].astype(f32), (1, A))),
        ("bg", params["bg"].astype(f32)),
    ]
    offs, rows, off = {}, [], 0
    for name, m in entries:
        r, c = int(m.shape[0]), int(m.shape[1])
        r8 = _round_up(r, 8)                          # 8-aligned slot -> sublane-aligned slices
        offs[name] = (off, r, c)
        rows.append(jnp.pad(m, ((0, r8 - r), (0, G - c))))
        off += r8
    w_misc = jnp.concatenate(rows, axis=0)            # [R, G], R is a multiple of 8
    return w1_bd, w_stack, w_misc, offs, Dp


def _context_encoder_kernel(x_ref, w1_ref, wm_ref, ws_ref, out_ref, *,
                            A, Bt, T, C, offs):
    """One batch tile. x_ref: [Bt*T, A*Dp]; out_ref: [Bt, 2*C + 2*A*C]."""
    f32 = jnp.float32
    N = Bt * T
    G = A * C

    def misc(name):                                    # 8-aligned, zero-cost ref view
        off, r, w = offs[name]
        return ws_ref[off:off + r, 0:w]

    x = x_ref[...]                                     # [N, A*Dp]

    # ---- transition_encode: block-diagonal per-agent MLP, one matmul per layer.
    h = jnp.maximum(jnp.dot(x, w1_ref[...], preferred_element_type=f32) + misc("bt1"), 0.0)
    h = jnp.maximum(jnp.dot(h, wm_ref[_W2], preferred_element_type=f32) + misc("bt2"), 0.0)
    ctx = jnp.dot(h, wm_ref[_W3], preferred_element_type=f32) + misc("bt3")       # [N, G]

    # ---- temporal_encode (PIA): tiled shared score weights, softmax over T.
    u = jnp.tanh(jnp.dot(ctx, wm_ref[_WQT], preferred_element_type=f32) + misc("bqt"))
    s = jnp.dot(u, misc("seg_vt"), preferred_element_type=f32)                    # [N, A]
    s3 = s.reshape(Bt, T, A)
    e_t = jnp.exp(s3 - jnp.max(s3, axis=1, keepdims=True))
    inv_t = pl.reciprocal(jnp.sum(e_t, axis=1, keepdims=True), approx=True)
    attn_t = (e_t * inv_t).reshape(N, A)
    w_full = jnp.dot(attn_t, misc("E"), preferred_element_type=f32)               # [N, G]
    ctx_ag = jnp.sum((w_full * ctx).reshape(Bt, T, G), axis=1)                    # [Bt, G]

    # ---- global_encode (PIA over agents, exact normalization) + global_log_std.
    ua = jnp.tanh(jnp.dot(ctx_ag, wm_ref[_WQA], preferred_element_type=f32) + misc("bqa"))
    sa = jnp.dot(ua, misc("seg_va"), preferred_element_type=f32)                  # [Bt, A]
    e_a = jnp.exp(sa - jnp.max(sa, axis=1, keepdims=True))
    attn_a = e_a / jnp.sum(e_a, axis=1, keepdims=True)
    wa_full = jnp.dot(attn_a, misc("E"), preferred_element_type=f32)              # [Bt, G]
    z_g = jnp.dot(wa_full * ctx_ag, misc("F"), preferred_element_type=f32)        # [Bt, C]
    lsg = jnp.dot(z_g, misc("wg"), preferred_element_type=f32) + misc("bg")       # [Bt, C]

    # ---- local_encode: block-diagonal per-agent MLPs + tiled shared local_log_std.
    hl = jnp.maximum(jnp.dot(ctx_ag, wm_ref[_WL1], preferred_element_type=f32) + misc("bl1"), 0.0)
    hl = jnp.maximum(jnp.dot(hl, wm_ref[_WL2], preferred_element_type=f32) + misc("bl2"), 0.0)
    z_l = jnp.dot(hl, wm_ref[_WL3], preferred_element_type=f32) + misc("bl3")     # [Bt, G]
    lsl = jnp.dot(z_l, wm_ref[_WLL], preferred_element_type=f32) + misc("bll")    # [Bt, G]

    # ---- single lane-dense store: [Bt, 2C + 2*A*C] (= 256 lanes in the demo config).
    out_ref[...] = jnp.concatenate([z_g, lsg, z_l, lsl], axis=-1)


@functools.partial(jax.jit, static_argnames=("context_dim", "block_b"))
def context_encoder_forward(obs_n, action_n, reward_n, next_obs_n, params, *,
                            context_dim, block_b=8):
    """obs_n/action_n/reward_n/next_obs_n: [A, B, T, dim] (agent-major, like the torch
    module's per-agent lists).  Returns (z_g [B,C], log_std_g [B,C],
    z_l [B,A,C], log_std_l [B,A,C])."""
    A, B, T, OBS = obs_n.shape
    ACT = action_n.shape[-1]
    C = context_dim
    H = params["wt2"].shape[-1]
    d_in = 2 * OBS + ACT + 1
    f32 = jnp.float32

    # ---- batch tile: fewest grid steps on single-TC v5e/v6e, but keep >=2 steps when
    #      B allows so ("parallel",) can shard across v7x's two TensorCores.
    def _ok(bb):
        return (bb >= 1 and B % bb == 0 and (bb * T) % 8 == 0
                and (bb % 8 == 0 or bb == B))
    if not _ok(block_b):
        block_b = B // 2 if (B % 2 == 0 and _ok(B // 2)) else B
    grid = (B // block_b,)
    n_rows = block_b * T

    # ---- pack weights (block-diagonal slabs, 8-aligned offsets).
    w1_bd, w_stack, w_misc, offs, Dp = _pack_params(
        params, n_agents=A, d_in=d_in, hidden=H, context_dim=C)

    # ---- single pre-concatenated input: per-agent (obs|act|rew|next_obs) padded to Dp
    #      lanes, laid out agent-major -> [B*T, A*Dp].  (Four skinny inputs, including
    #      the 1-lane reward tile, become one dense DMA.)
    feats = jnp.concatenate([obs_n, action_n, reward_n, next_obs_n], axis=-1).astype(f32)
    feats = jnp.pad(feats, ((0, 0), (0, 0), (0, 0), (0, Dp - d_in)))
    x = jnp.transpose(feats, (1, 2, 0, 3)).reshape(B * T, A * Dp)

    out_w = 2 * C + 2 * A * C
    kernel = functools.partial(_context_encoder_kernel,
                               A=A, Bt=block_b, T=T, C=C, offs=offs)

    out = pl.pallas_call(
        kernel,
        out_shape=jax.ShapeDtypeStruct((B, out_w), f32),
        grid=grid,
        in_specs=[
            pl.BlockSpec((n_rows, A * Dp), lambda b: (b, 0)),
            pl.BlockSpec(w1_bd.shape, lambda b: (0, 0)),
            pl.BlockSpec(w_stack.shape, lambda b: (0, 0, 0)),
            pl.BlockSpec(w_misc.shape, lambda b: (0, 0)),
        ],
        out_specs=pl.BlockSpec((block_b, out_w), lambda b: (b, 0)),
        compiler_params=pltpu.CompilerParams(
            dimension_semantics=("parallel",),         # batch tiles are independent
            # explicit VMEM budget (usage here is ~1 MB); stays under v7x's 64 MiB
            # physical VMEM even when block_b / H / C are scaled up.
            vmem_limit_bytes=64 * 1024 * 1024),
    )(x, w1_bd, w_stack, w_misc)

    z_g = out[:, :C]
    log_std_g = out[:, C:2 * C]
    z_l = out[:, 2 * C:2 * C + A * C].reshape(B, A, C)
    log_std_l = out[:, 2 * C + A * C:].reshape(B, A, C)
    return z_g, log_std_g, z_l, log_std_l


def _reference_forward(obs_n, action_n, reward_n, next_obs_n, params, *, context_dim):
    """Pure-JAX reference of the same forward math (mirrors the torch module)."""
    A, B, T, _ = obs_n.shape
    C = context_dim
    x = jnp.concatenate([obs_n, action_n, reward_n, next_obs_n], axis=-1)
    x = x.reshape(A, B * T, -1).astype(jnp.float32)

    h = jax.nn.relu(jnp.einsum("and,adh->anh", x, params["wt1"]) + params["bt1"])
    h = jax.nn.relu(jnp.einsum("anh,ahk->ank", h, params["wt2"]) + params["bt2"])
    ctx = jnp.einsum("anh,ahc->anc", h, params["wt3"]) + params["bt3"]   # [A, B*T, C]

    s = jnp.tanh(ctx @ params["wqt"] + params["bqt"])
    s = jnp.sum(s * params["vt"], axis=-1, keepdims=True)
    ctx4 = ctx.reshape(A, B, T, C)
    attn_t = jax.nn.softmax(s.reshape(A, B, T, 1), axis=2)
    ctx_ag = jnp.sum(attn_t * ctx4, axis=2)                              # [A, B, C]

    sa = jnp.tanh(ctx_ag @ params["wqa"] + params["bqa"])
    sa = jnp.sum(sa * params["va"], axis=-1, keepdims=True)
    attn_a = jax.nn.softmax(sa, axis=0)
    z_g = jnp.sum(attn_a * ctx_ag, axis=0)                               # [B, C]
    log_std_g = z_g @ params["wg"] + params["bg"]

    hl = jax.nn.relu(jnp.einsum("abc,ach->abh", ctx_ag, params["wl1"]) + params["bl1"])
    hl = jax.nn.relu(jnp.einsum("abh,ahk->abk", hl, params["wl2"]) + params["bl2"])
    z_l = jnp.einsum("abh,ahc->abc", hl, params["wl3"]) + params["bl3"]  # [A, B, C]
    log_std_l = z_l @ params["wll"] + params["bll"]
    return (z_g, log_std_g,
            jnp.transpose(z_l, (1, 0, 2)), jnp.transpose(log_std_l, (1, 0, 2)))


if __name__ == "__main__":
    # cfg: n_agents=3, obs_dim_n=[10]*3, action_dim_n=[4]*3, context_dim=32,
    #      hidden_sizes_mlp=[32, 32]; meta_batch B=16, sequence length T=8,
    #      batch tile block_b=8 -> grid=(2,) (pipelined + megacore-shardable).
    A, B, T = 3, 16, 8
    OBS, ACT, C, H = 10, 4, 32, 32

    key = jax.random.PRNGKey(0)
    k_obs, k_act, k_rew, k_nobs, k_par = jax.random.split(key, 5)
    obs_n = jax.random.normal(k_obs, (A, B, T, OBS), jnp.float32)
    action_n = jax.random.normal(k_act, (A, B, T, ACT), jnp.float32)
    reward_n = jax.random.normal(k_rew, (A, B, T, 1), jnp.float32)
    next_obs_n = jax.random.normal(k_nobs, (A, B, T, OBS), jnp.float32)

    params = init_params(k_par, n_agents=A, d_in=2 * OBS + ACT + 1,
                         hidden=H, context_dim=C)

    outs = context_encoder_forward(obs_n, action_n, reward_n, next_obs_n, params,
                                   context_dim=C, block_b=8)
    outs = jax.block_until_ready(outs)

    refs = _reference_forward(obs_n, action_n, reward_n, next_obs_n, params,
                              context_dim=C)

    expected_shapes = [(B, C), (B, C), (B, A, C), (B, A, C)]
    for o, r, es in zip(outs, refs, expected_shapes):
        assert o.shape == es, (o.shape, es)
        assert bool(jnp.all(jnp.isfinite(o)))
        # tolerance loosened slightly vs exact math: the temporal softmax denominator
        # uses pl.reciprocal(approx=True) inside the kernel.
        assert bool(jnp.allclose(o, r, atol=2e-3, rtol=2e-3)), \
            float(jnp.max(jnp.abs(o - r)))

    print("KERNEL_OK")
</pallas_src>

<mosaic_0001>
module attributes {stable_mosaic.version = 11 : i64} {
  func.func @_context_encoder_kernel(%arg0: i32, %arg1: memref<64x96xf32, #tpu.memory_space<vmem>>, %arg2: memref<96x96xf32, #tpu.memory_space<vmem>>, %arg3: memref<8x96x96xf32, #tpu.memory_space<vmem>>, %arg4: memref<408x96xf32, #tpu.memory_space<vmem>>, %arg5: memref<8x256xf32, #tpu.memory_space<vmem>>) attributes {dimension_semantics = [#tpu.dimension_semantics<parallel>], iteration_bounds = array<i64: 2>, scalar_prefetch = 0 : i64, scratch_operands = 0 : i64, tpu.core_type = #tpu.core_type<tc>, window_params = [{transform_indices = @transform_0, window_bounds = array<i64: 64, 96>}, {pipeline_mode = #tpu.pipeline_mode<synchronous>, transform_indices = @transform_1, window_bounds = array<i64: 96, 96>}, {pipeline_mode = #tpu.pipeline_mode<synchronous>, transform_indices = @transform_2, window_bounds = array<i64: 8, 96, 96>}, {pipeline_mode = #tpu.pipeline_mode<synchronous>, transform_indices = @transform_3, window_bounds = array<i64: 408, 96>}, {transform_indices = @transform_4, window_bounds = array<i64: 8, 256>}]} {
    %c0 = arith.constant 0 : index
    %c0_0 = arith.constant 0 : index
    %0 = vector.load %arg1[%c0, %c0_0] : memref<64x96xf32, #tpu.memory_space<vmem>>, vector<64x96xf32>
    %c0_1 = arith.constant 0 : index
    %c0_2 = arith.constant 0 : index
    %1 = vector.load %arg2[%c0_1, %c0_2] : memref<96x96xf32, #tpu.memory_space<vmem>>, vector<96x96xf32>
    %cst = arith.constant dense<0.000000e+00> : vector<64x96xf32>
    %2 = tpu.matmul %0, %1, %cst {dimension_numbers = #tpu.dot_dimension_numbers<[1], [0], [0], [1], [0, 0, 1, 1], [], []>} : vector<64x96xf32>, vector<96x96xf32>, vector<64x96xf32> -> vector<64x96xf32>
    %c328 = arith.constant 328 : index
    %c0_3 = arith.constant 0 : index
    %3 = vector.load %arg4[%c328, %c0_3] : memref<408x96xf32, #tpu.memory_space<vmem>>, vector<1x96xf32>
    %4 = vector.broadcast %3 : vector<1x96xf32> to vector<64x96xf32>
    %5 = arith.addf %2, %4 : vector<64x96xf32>
    %cst_4 = arith.constant 0.000000e+00 : f32
    %6 = vector.broadcast %cst_4 : f32 to vector<64x96xf32>
    %7 = arith.maximumf %5, %6 : vector<64x96xf32>
    %c0_5 = arith.constant 0 : index
    %c0_6 = arith.constant 0 : index
    %c0_7 = arith.constant 0 : index
    %8 = vector.load %arg3[%c0_5, %c0_6, %c0_7] : memref<8x96x96xf32, #tpu.memory_space<vmem>>, vector<1x96x96xf32>
    %9 = vector.shape_cast %8 : vector<1x96x96xf32> to vector<96x96xf32>
    %cst_8 = arith.constant dense<0.000000e+00> : vector<64x96xf32>
    %10 = tpu.matmul %7, %9, %cst_8 {dimension_numbers = #tpu.dot_dimension_numbers<[1], [0], [0], [1], [0, 0, 1, 1], [], []>} : vector<64x96xf32>, vector<96x96xf32>, vector<64x96xf32> -> vector<64x96xf32>
    %c336 = arith.constant 336 : index
    %c0_9 = arith.constant 0 : index
    %11 = vector.load %arg4[%c336, %c0_9] : memref<408x96xf32, #tpu.memory_space<vmem>>, vector<1x96xf32>
    %12 = vector.broadcast %11 : vector<1x96xf32> to vector<64x96xf32>
    %13 = arith.addf %10, %12 : vector<64x96xf32>
    %cst_10 = arith.constant 0.000000e+00 : f32
    %14 = vector.broadcast %cst_10 : f32 to vector<64x96xf32>
    %15 = arith.maximumf %13, %14 : vector<64x96xf32>
    %c1 = arith.constant 1 : index
    %c0_11 = arith.constant 0 : index
    %c0_12 = arith.constant 0 : index
    %16 = vector.load %arg3[%c1, %c0_11, %c0_12] : memref<8x96x96xf32, #tpu.memory_space<vmem>>, vector<1x96x96xf32>
    %17 = vector.shape_cast %16 : vector<1x96x96xf32> to vector<96x96xf32>
    %cst_13 = arith.constant dense<0.000000e+00> : vector<64x96xf32>
    %18 = tpu.matmul %15, %17, %cst_13 {dimension_numbers = #tpu.dot_dimension_numbers<[1], [0], [0], [1], [0, 0, 1, 1], [], []>} : vector<64x96xf32>, vector<96x96xf32>, vector<64x96xf32> -> vector<64x96xf32>
    %c344 = arith.constant 344 : index
    %c0_14 = arith.constant 0 : index
    %19 = vector.load %arg4[%c344, %c0_14] : memref<408x96xf32, #tpu.memory_space<vmem>>, vector<1x96xf32>
    %20 = vector.broadcast %19 : vector<1x96xf32> to vector<64x96xf32>
    %21 = arith.addf %18, %20 : vector<64x96xf32>
    %c5 = arith.constant 5 : index
    %c0_15 = arith.constant 0 : index
    %c0_16 = arith.constant 0 : index
    %22 = vector.load %arg3[%c5, %c0_15, %c0_16] : memref<8x96x96xf32, #tpu.memory_space<vmem>>, vector<1x96x96xf32>
    %23 = vector.shape_cast %22 : vector<1x96x96xf32> to vector<96x96xf32>
    %cst_17 = arith.constant dense<0.000000e+00> : vector<64x96xf32>
    %24 = tpu.matmul %21, %23, %cst_17 {dimension_numbers = #tpu.dot_dimension_numbers<[1], [0], [0], [1], [0, 0, 1, 1], [], []>} : vector<64x96xf32>, vector<96x96xf32>, vector<64x96xf32> -> vector<64x96xf32>
    %c352 = arith.constant 352 : index
    %c0_18 = arith.constant 0 : index
    %25 = vector.load %arg4[%c352, %c0_18] : memref<408x96xf32, #tpu.memory_space<vmem>>, vector<1x96xf32>
    %26 = vector.broadcast %25 : vector<1x96xf32> to vector<64x96xf32>
    %27 = arith.addf %24, %26 : vector<64x96xf32>
    %28 = math.tanh %27 : vector<64x96xf32>
    %c0_19 = arith.constant 0 : index
    %c0_20 = arith.constant 0 : index
    %29 = vector.load %arg4[%c0_19, %c0_20] : memref<408x96xf32, #tpu.memory_space<vmem>>, vector<96x3xf32>
    %cst_21 = arith.constant dense<0.000000e+00> : vector<64x3xf32>
    %30 = tpu.matmul %28, %29, %cst_21 {dimension_numbers = #tpu.dot_dimension_numbers<[1], [0], [0], [1], [0, 0, 1, 1], [], []>} : vector<64x96xf32>, vector<96x3xf32>, vector<64x3xf32> -> vector<64x3xf32>
    %31 = vector.shape_cast %30 : vector<64x3xf32> to vector<8x8x3xf32>
    %cst_22 = arith.constant dense<0xFF800000> : vector<8x3xf32>
    %32 = vector.multi_reduction <maximumf>, %31, %cst_22 [1] : vector<8x8x3xf32> to vector<8x3xf32>
    %33 = vector.shape_cast %32 : vector<8x3xf32> to vector<8x1x3xf32>
    %34 = vector.broadcast %33 : vector<8x1x3xf32> to vector<8x8x3xf32>
    %35 = arith.subf %31, %34 : vector<8x8x3xf32>
    %36 = math.exp %35 : vector<8x8x3xf32>
    %cst_23 = arith.constant dense<0.000000e+00> : vector<8x3xf32>
    %37 = vector.multi_reduction <add>, %36, %cst_23 [1] : vector<8x8x3xf32> to vector<8x3xf32>
    %38 = vector.shape_cast %37 : vector<8x3xf32> to vector<8x1x3xf32>
    %39 = tpu.reciprocal %38 {approx = true} : vector<8x1x3xf32> -> vector<8x1x3xf32>
    %40 = vector.broadcast %39 : vector<8x1x3xf32> to vector<8x8x3xf32>
    %41 = arith.mulf %36, %40 : vector<8x8x3xf32>
    %42 = vector.shape_cast %41 : vector<8x8x3xf32> to vector<64x3xf32>
    %c192 = arith.constant 192 : index
    %c0_24 = arith.constant 0 : index
    %43 = vector.load %arg4[%c192, %c0_24] : memref<408x96xf32, #tpu.memory_space<vmem>>, vector<3x96xf32>
    %cst_25 = arith.constant dense<0.000000e+00> : vector<64x96xf32>
    %44 = tpu.matmul %42, %43, %cst_25 {dimension_numbers = #tpu.dot_dimension_numbers<[1], [0], [0], [1], [0, 0, 1, 1], [], []>} : vector<64x3xf32>, vector<3x96xf32>, vector<64x96xf32> -> vector<64x96xf32>
    %45 = arith.mulf %44, %21 : vector<64x96xf32>
    %46 = vector.shape_cast %45 : vector<64x96xf32> to vector<8x8x96xf32>
    %cst_26 = arith.constant dense<0.000000e+00> : vector<8x96xf32>
    %47 = vector.multi_reduction <add>, %46, %cst_26 [1] : vector<8x8x96xf32> to vector<8x96xf32>
    %c6 = arith.constant 6 : index
    %c0_27 = arith.constant 0 : index
    %c0_28 = arith.constant 0 : index
    %48 = vector.load %arg3[%c6, %c0_27, %c0_28] : memref<8x96x96xf32, #tpu.memory_space<vmem>>, vector<1x96x96xf32>
    %49 = vector.shape_cast %48 : vector<1x96x96xf32> to vector<96x96xf32>
    %cst_29 = arith.constant dense<0.000000e+00> : vector<8x96xf32>
    %50 = tpu.matmul %47, %49, %cst_29 {dimension_numbers = #tpu.dot_dimension_numbers<[1], [0], [0], [1], [0, 0, 1, 1], [], []>} : vector<8x96xf32>, vector<96x96xf32>, vector<8x96xf32> -> vector<8x96xf32>
    %c360 = arith.constant 360 : index
    %c0_30 = arith.constant 0 : index
    %51 = vector.load %arg4[%c360, %c0_30] : memref<408x96xf32, #tpu.memory_space<vmem>>, vector<1x96xf32>
    %52 = vector.broadcast %51 : vector<1x96xf32> to vector<8x96xf32>
    %53 = arith.addf %50, %52 : vector<8x96xf32>
    %54 = math.tanh %53 : vector<8x96xf32>
    %c96 = arith.constant 96 : index
    %c0_31 = arith.constant 0 : index
    %55 = vector.load %arg4[%c96, %c0_31] : memref<408x96xf32, #tpu.memory_space<vmem>>, vector<96x3xf32>
    %cst_32 = arith.constant dense<0.000000e+00> : vector<8x3xf32>
    %56 = tpu.matmul %54, %55, %cst_32 {dimension_numbers = #tpu.dot_dimension_numbers<[1], [0], [0], [1], [0, 0, 1, 1], [], []>} : vector<8x96xf32>, vector<96x3xf32>, vector<8x3xf32> -> vector<8x3xf32>
    %cst_33 = arith.constant dense<0xFF800000> : vector<8xf32>
    %57 = vector.multi_reduction <maximumf>, %56, %cst_33 [1] : vector<8x3xf32> to vector<8xf32>
    %58 = vector.shape_cast %57 : vector<8xf32> to vector<8x1xf32>
    %59 = vector.broadcast %58 : vector<8x1xf32> to vector<8x3xf32>
    %60 = arith.subf %56, %59 : vector<8x3xf32>
    %61 = math.exp %60 : vector<8x3xf32>
    %cst_34 = arith.constant dense<0.000000e+00> : vector<8xf32>
    %62 = vector.multi_reduction <add>, %61, %cst_34 [1] : vector<8x3xf32> to vector<8xf32>
    %63 = vector.shape_cast %62 : vector<8xf32> to vector<8x1xf32>
    %64 = vector.broadcast %63 : vector<8x1xf32> to vector<8x3xf32>
    %65 = arith.divf %61, %64 : vector<8x3xf32>
    %c192_35 = arith.constant 192 : index
    %c0_36 = arith.constant 0 : index
    %66 = vector.load %arg4[%c192_35, %c0_36] : memref<408x96xf32, #tpu.memory_space<vmem>>, vector<3x96xf32>
    %cst_37 = arith.constant dense<0.000000e+00> : vector<8x96xf32>
    %67 = tpu.matmul %65, %66, %cst_37 {dimension_numbers = #tpu.dot_dimension_numbers<[1], [0], [0], [1], [0, 0, 1, 1], [], []>} : vector<8x3xf32>, vector<3x96xf32>, vector<8x96xf32> -> vector<8x96xf32>
    %68 = arith.mulf %67, %47 : vector<8x96xf32>
    %c200 = arith.constant 200 : index
    %c0_38 = arith.constant 0 : index
    %69 = vector.load %arg4[%c200, %c0_38] : memref<408x96xf32, #tpu.memory_space<vmem>>, vector<96x32xf32>
    %cst_39 = arith.constant dense<0.000000e+00> : vector<8x32xf32>
    %70 = tpu.matmul %68, %69, %cst_39 {dimension_numbers = #tpu.dot_dimension_numbers<[1], [0], [0], [1], [0, 0, 1, 1], [], []>} : vector<8x96xf32>, vector<96x32xf32>, vector<8x32xf32> -> vector<8x32xf32>
    %c296 = arith.constant 296 : index
    %c0_40 = arith.constant 0 : index
    %71 = vector.load %arg4[%c296, %c0_40] : memref<408x96xf32, #tpu.memory_space<vmem>>, vector<32x32xf32>
    %cst_41 = arith.constant dense<0.000000e+00> : vector<8x32xf32>
    %72 = tpu.matmul %70, %71, %cst_41 {dimension_numbers = #tpu.dot_dimension_numbers<[1], [0], [0], [1], [0, 0, 1, 1], [], []>} : vector<8x32xf32>, vector<32x32xf32>, vector<8x32xf32> -> vector<8x32xf32>
    %c400 = arith.constant 400 : index
    %c0_42 = arith.constant 0 : index
    %73 = vector.load %arg4[%c400, %c0_42] : memref<408x96xf32, #tpu.memory_space<vmem>>, vector<1x32xf32>
    %74 = vector.broadcast %73 : vector<1x32xf32> to vector<8x32xf32>
    %75 = arith.addf %72, %74 : vector<8x32xf32>
    %c2 = arith.constant 2 : index
    %c0_43 = arith.constant 0 : index
    %c0_44 = arith.constant 0 : index
    %76 = vector.load %arg3[%c2, %c0_43, %c0_44] : memref<8x96x96xf32, #tpu.memory_space<vmem>>, vector<1x96x96xf32>
    %77 = vector.shape_cast %76 : vector<1x96x96xf32> to vector<96x96xf32>
    %cst_45 = arith.constant dense<0.000000e+00> : vector<8x96xf32>
    %78 = tpu.matmul %47, %77, %cst_45 {dimension_numbers = #tpu.dot_dimension_numbers<[1], [0], [0], [1], [0, 0, 1, 1], [], []>} : vector<8x96xf32>, vector<96x96xf32>, vector<8x96xf32> -> vector<8x96xf32>
    %c368 = arith.constant 368 : index
    %c0_46 = arith.constant 0 : index
    %79 = vector.load %arg4[%c368, %c0_46] : memref<408x96xf32, #tpu.memory_space<vmem>>, vector<1x96xf32>
    %80 = vector.broadcast %79 : vector<1x96xf32> to vector<8x96xf32>
    %81 = arith.addf %78, %80 : vector<8x96xf32>
    %cst_47 = arith.constant 0.000000e+00 : f32
    %82 = vector.broadcast %cst_47 : f32 to vector<8x96xf32>
    %83 = arith.maximumf %81, %82 : vector<8x96xf32>
    %c3 = arith.constant 3 : index
    %c0_48 = arith.constant 0 : index
    %c0_49 = arith.constant 0 : index
    %84 = vector.load %arg3[%c3, %c0_48, %c0_49] : memref<8x96x96xf32, #tpu.memory_space<vmem>>, vector<1x96x96xf32>
    %85 = vector.shape_cast %84 : vector<1x96x96xf32> to vector<96x96xf32>
    %cst_50 = arith.constant dense<0.000000e+00> : vector<8x96xf32>
    %86 = tpu.matmul %83, %85, %cst_50 {dimension_numbers = #tpu.dot_dimension_numbers<[1], [0], [0], [1], [0, 0, 1, 1], [], []>} : vector<8x96xf32>, vector<96x96xf32>, vector<8x96xf32> -> vector<8x96xf32>
    %c376 = arith.constant 376 : index
    %c0_51 = arith.constant 0 : index
    %87 = vector.load %arg4[%c376, %c0_51] : memref<408x96xf32, #tpu.memory_space<vmem>>, vector<1x96xf32>
    %88 = vector.broadcast %87 : vector<1x96xf32> to vector<8x96xf32>
    %89 = arith.addf %86, %88 : vector<8x96xf32>
    %cst_52 = arith.constant 0.000000e+00 : f32
    %90 = vector.broadcast %cst_52 : f32 to vector<8x96xf32>
    %91 = arith.maximumf %89, %90 : vector<8x96xf32>
    %c4 = arith.constant 4 : index
    %c0_53 = arith.constant 0 : index
    %c0_54 = arith.constant 0 : index
    %92 = vector.load %arg3[%c4, %c0_53, %c0_54] : memref<8x96x96xf32, #tpu.memory_space<vmem>>, vector<1x96x96xf32>
    %93 = vector.shape_cast %92 : vector<1x96x96xf32> to vector<96x96xf32>
    %cst_55 = arith.constant dense<0.000000e+00> : vector<8x96xf32>
    %94 = tpu.matmul %91, %93, %cst_55 {dimension_numbers = #tpu.dot_dimension_numbers<[1], [0], [0], [1], [0, 0, 1, 1], [], []>} : vector<8x96xf32>, vector<96x96xf32>, vector<8x96xf32> -> vector<8x96xf32>
    %c384 = arith.constant 384 : index
    %c0_56 = arith.constant 0 : index
    %95 = vector.load %arg4[%c384, %c0_56] : memref<408x96xf32, #tpu.memory_space<vmem>>, vector<1x96xf32>
    %96 = vector.broadcast %95 : vector<1x96xf32> to vector<8x96xf32>
    %97 = arith.addf %94, %96 : vector<8x96xf32>
    %c7 = arith.constant 7 : index
    %c0_57 = arith.constant 0 : index
    %c0_58 = arith.constant 0 : index
    %98 = vector.load %arg3[%c7, %c0_57, %c0_58] : memref<8x96x96xf32, #tpu.memory_space<vmem>>, vector<1x96x96xf32>
    %99 = vector.shape_cast %98 : vector<1x96x96xf32> to vector<96x96xf32>
    %cst_59 = arith.constant dense<0.000000e+00> : vector<8x96xf32>
    %100 = tpu.matmul %97, %99, %cst_59 {dimension_numbers = #tpu.dot_dimension_numbers<[1], [0], [0], [1], [0, 0, 1, 1], [], []>} : vector<8x96xf32>, vector<96x96xf32>, vector<8x96xf32> -> vector<8x96xf32>
    %c392 = arith.constant 392 : index
    %c0_60 = arith.constant 0 : index
    %101 = vector.load %arg4[%c392, %c0_60] : memref<408x96xf32, #tpu.memory_space<vmem>>, vector<1x96xf32>
    %102 = vector.broadcast %101 : vector<1x96xf32> to vector<8x96xf32>
    %103 = arith.addf %100, %102 : vector<8x96xf32>
    %104 = tpu.concatenate %70, %75, %97, %103 in 1 : vector<8x32xf32>, vector<8x32xf32>, vector<8x96xf32>, vector<8x96xf32> -> vector<8x256xf32>
    %c0_61 = arith.constant 0 : index
    %c0_62 = arith.constant 0 : index
    %105 = vector.load %arg5[%c0_61, %c0_62] : memref<8x256xf32, #tpu.memory_space<vmem>>, vector<8x256xf32>
    tpu.vector_store %arg5[%c0_61, %c0_62], %104 {strides = array<i32>} : memref<8x256xf32, #tpu.memory_space<vmem>>, vector<8x256xf32>,
    return
  }
  func.func @transform_0(%arg0: i32) -> (i32, i32) {
    %c0_i32 = arith.constant 0 : i32
    %c0_i32_0 = arith.constant 0 : i32
    return %arg0, %c0_i32 : i32, i32
  }
  func.func @transform_1(%arg0: i32) -> (i32, i32) {
    %c0_i32 = arith.constant 0 : i32
    %c0_i32_0 = arith.constant 0 : i32
    %c0_i32_1 = arith.constant 0 : i32
    return %c0_i32, %c0_i32_0 : i32, i32
  }
  func.func @transform_2(%arg0: i32) -> (i32, i32, i32) {
    %c0_i32 = arith.constant 0 : i32
    %c0_i32_0 = arith.constant 0 : i32
    %c0_i32_1 = arith.constant 0 : i32
    %c0_i32_2 = arith.constant 0 : i32
    return %c0_i32, %c0_i32_0, %c0_i32_1 : i32, i32, i32
  }
  func.func @transform_3(%arg0: i32) -> (i32, i32) {
    %c0_i32 = arith.constant 0 : i32
    %c0_i32_0 = arith.constant 0 : i32
    %c0_i32_1 = arith.constant 0 : i32
    return %c0_i32, %c0_i32_0 : i32, i32
  }
  func.func @transform_4(%arg0: i32) -> (i32, i32) {
    %c0_i32 = arith.constant 0 : i32
    %c0_i32_0 = arith.constant 0 : i32
    return %arg0, %c0_i32 : i32, i32
  }
}

</mosaic_0001>

<bundles_post_ra>
// kernel: context_encoder_forward.1
= control target key start
LH: loop header
LB: loop body
LE: loop exit
PB: predicated region body
PF: predicated region fallthrough
CT: control target
= control target key end

     0   :  { %s1611_s15 = smov 0   ;;  %s2254_s0 = inlined_call_operand.vmem [shape: f32[128,96], index: 0, kind: input, shape index: {}]   ;;  %s2255_s1 = inlined_call_operand.vmem [shape: f32[96,96], index: 1, kind: input, shape index: {}]   ;;  %s2256_s2 = inlined_call_operand.vmem [shape: f32[8,96,96], index: 2, kind: input, shape index: {}]   ;;  %s2257_s3 = inlined_call_operand.vmem [shape: f32[408,96], index: 3, kind: input, shape index: {}]   ;;  %s2258_s4 = inlined_call_operand.vmem [shape: f32[16,256], index: 4, kind: output, shape index: {}]  }
   0x1 LB: > { %s1617_s16 = sadd.s32 4294967295, %s1582_s15   ;;  %p1351_p0 = scmp.ge.s32.totalorder %s1582_s15, 1  ;;  %s1582_s15 = sphi %s1611_s15, %s14_s15  }
   0x2   : > { %p163_p1 = scmp.lt.s32.totalorder %s1582_s15, 3 }
   0x4   : > { %p164_p2 = pnand %p1351_p0, %p163_p1 }
   0x5   : > { %s1352_s25 = sshll.u32 (!%p164_p2), %s1617_s16, 3  ;;  %s1584_s8 = smov (!%p164_p2), 32  }
   0x6   : > { %167 = sbr.rel (%p164_p2) target bundleno = 2373 (0x945), region = 36  ;;  %p190_p3 = scmp.lt.s32.totalorder (!%p164_p2), %s1352_s25, 15 }
   0x7   : > { %s1585_s28 = smov (!%p164_p2), 64   ;;  %p195_p4 = scmp.lt.s32.totalorder (!%p164_p2), %s1617_s16, 1 }
   0xb   : > { %v219_v0 = vld [vmem:[%s2255_s1 + $0x58] sm:$0xff]  ;;  %v218_v1 = vld [vmem:[%s2255_s1 + $0x50] sm:$0xff]  ;;  %v217_v2 = vld [vmem:[%s2255_s1 + $0x48] sm:$0xff]  ;;  %s2260_s25 = smov (!%p190_p3, %s1352_s25), 15  ;;  %vm222_vm0 = vcmask 785408   ;;  %vm806_vm1 = vcmask 1042432  }
   0xc   : > { %251 = vmatpush.msra.mxu0 %v219_v0  ;;  %v216_v3 = vld [vmem:[%s2255_s1 + $0x40] sm:$0xff]  ;;  %v215_v4 = vld [vmem:[%s2255_s1 + $0x38] sm:$0xff]  ;;  %v214_v5 = vld [vmem:[%s2255_s1 + $0x30] sm:$0xff]  ;;  %s1353_s10 = sshll.u32 %s2260_s25, 3  ;;  %vm628_vm2 = vcmask 23552   ;;  %vm938_vm3 = vcmask 1041409  }
   0xd   : > { %v213_v6 = vld [vmem:[%s2255_s1 + $0x28] sm:$0xff]  ;;  %v212_v7 = vld [vmem:[%s2255_s1 + $0x20] sm:$0xff]  ;;  %v211_v8 = vld [vmem:[%s2255_s1 + $0x18] sm:$0xff]  ;;  %s1658_s19 = scalar_lea.vmem %s2254_s0, %s1353_s10  ;;  %vm940_vm4 = vcmask 1042434   ;;  %vm942_vm5 = vcmask 1043459   ;;  %vm944_vm6 = vcmask 1044484  }
   0xe   : > { %252 = vmatpush.msra.mxu0 %v218_v1  ;;  %v210_v9 = vld [vmem:[%s2255_s1 + $0x10] sm:$0xff]  ;;  %v209_v10 = vld [vmem:[%s2255_s1 + $0x8] sm:$0xff]  ;;  %v208_v11 = vld [vmem:[%s2255_s1] sm:$0xff]  ;;  %vm946_vm7 = vcmask 1045509   ;;  %vm948_vm8 = vcmask 1046534   ;;  %vm950_vm9 = vcmask 1047559  }
   0xf   : > { %v200_v12 = vld [vmem:[%s1658_s19] sm:$0xff]  ;;  %v201_v13 = vld [vmem:[%s1658_s19 + $0x8] sm:$0xff]  ;;  %v202_v14 = vld [vmem:[%s1658_s19 + $0x10] sm:$0xff]  ;;  %vm1100_vm14 = vcmask 261120   ;;  %s2262_s16 = smov (!%p195_p4, %s1617_s16), 1  ;;  %vm1287_vm15 = vcmask 523264  }
  0x10   : > { %253 = vmatpush.msra.mxu0 %v217_v2  ;;  %v203_v15 = vld [vmem:[%s1658_s19 + $0x18] sm:$0xff]  ;;  %v306_v17 = vld [vmem:[%s2256_s2 + $0x50] sm:$0xff]  ;;  %v305_v18 = vld [vmem:[%s2256_s2 + $0x48] sm:$0xff]  ;;  %s1501_s29 = sshll.u32 %s2262_s16, 4 }
  0x11   : > { %v307_v16 = vld [vmem:[%s2256_s2 + $0x58] sm:$0xff]  ;;  %v304_v19 = vld [vmem:[%s2256_s2 + $0x40] sm:$0xff]  ;;  %v302_v22 = vld [vmem:[%s2256_s2 + $0x30] sm:$0xff]  ;;  %s199_s6 = scalar_lea.vmem %s2258_s4, %s1501_s29 }
  0x12   : > { %254 = vmatpush.msra.mxu0 %v216_v3  ;;  %338 = vmatpush.msra.mxu1 %v307_v16  ;;  %v204_v20 = vld [vmem:[%s1658_s19 + $0x20] sm:$0xff]  ;;  %v303_v21 = vld [vmem:[%s2256_s2 + $0x38] sm:$0xff]  ;;  %v301_v23 = vld [vmem:[%s2256_s2 + $0x28] sm:$0xff] }
  0x13   : > { %v300_v24 = vld [vmem:[%s2256_s2 + $0x20] sm:$0xff]  ;;  %v205_v25 = vld [vmem:[%s1658_s19 + $0x28] sm:$0xff]  ;;  %v299_v26 = vld [vmem:[%s2256_s2 + $0x18] sm:$0xff] }
  0x14   : > { %255 = vmatpush.msra.mxu0 %v215_v4  ;;  %339 = vmatpush.msra.mxu1 %v306_v17  ;;  %v206_v27 = vld [vmem:[%s1658_s19 + $0x30] sm:$0xff]  ;;  %v207_v28 = vld [vmem:[%s1658_s19 + $0x38] sm:$0xff]  ;;  %v297_v30 = vld [vmem:[%s2256_s2 + $0x8] sm:$0xff] }
  0x15   : > { %v298_v29 = vld [vmem:[%s2256_s2 + $0x10] sm:$0xff]  ;;  %v296_v31 = vld [vmem:[%s2256_s2] sm:$0xff]  ;;  %v1512_v32 = vld [vmem:[%s2257_s3 + $0x148] ss:$0 sm:$0xff] }
  0x16   : > { %256 = vmatpush.msra.mxu0 %v214_v5  ;;  %340 = vmatpush.msra.mxu1 %v305_v18  ;;  %v1383_v45 = vld [vmem:[%s2256_s2 + $0xb8] sm:$0xff]  ;;  %v1382_v46 = vld [vmem:[%s2256_s2 + $0xb0] sm:$0xff]  ;;  %v1381_v47 = vld [vmem:[%s2256_s2 + $0xa8] sm:$0xff] }
  0x17   : > { %426 = vmatpush.msra.mxu2 %v1383_v45  ;;  %v1380_v50 = vld [vmem:[%s2256_s2 + $0xa0] sm:$0xff]  ;;  %v1379_v52 = vld [vmem:[%s2256_s2 + $0x98] sm:$0xff]  ;;  %v1378_v53 = vld [vmem:[%s2256_s2 + $0x90] sm:$0xff] }
  0x18   : > { %257 = vmatpush.msra.mxu0 %v213_v6  ;;  %341 = vmatpush.msra.mxu1 %v304_v19  ;;  %v1377_v54 = vld [vmem:[%s2256_s2 + $0x88] sm:$0xff]  ;;  %v1376_v57 = vld [vmem:[%s2256_s2 + $0x80] sm:$0xff]  ;;  %v1375_v59 = vld [vmem:[%s2256_s2 + $0x78] sm:$0xff] }
  0x19   : > { %427 = vmatpush.msra.mxu2 %v1382_v46  ;;  %v1374_v2 = vld [vmem:[%s2256_s2 + $0x70] sm:$0xff]  ;;  %v1373_v3 = vld [vmem:[%s2256_s2 + $0x68] sm:$0xff]  ;;  %v1372_v4 = vld [vmem:[%s2256_s2 + $0x60] sm:$0xff] }
  0x1a   : > { %258 = vmatpush.msra.mxu0 %v212_v7  ;;  %342 = vmatpush.msra.mxu1 %v303_v21  ;;  %v1513_v5 = vld [vmem:[%s2257_s3 + $0x150] ss:$0 sm:$0xff]  ;;  %v1403_v18 = vld [vmem:[%s2256_s2 + $0x238] sm:$0xff] }
  0x1b   : > { %428 = vmatpush.msra.mxu2 %v1381_v47  ;;  %v1402_v19 = vld [vmem:[%s2256_s2 + $0x230] sm:$0xff]  ;;  %506 = vmatpush.msra.mxu3 %v1403_v18 }
  0x1c   : > { %259 = vmatpush.msra.mxu0 %v211_v8  ;;  %343 = vmatpush.msra.mxu1 %v302_v22 }
  0x1d   : > { %429 = vmatpush.msra.mxu2 %v1380_v50  ;;  %507 = vmatpush.msra.mxu3 %v1402_v19 }
  0x1e   : > { %260 = vmatpush.msra.mxu0 %v210_v9  ;;  %344 = vmatpush.msra.mxu1 %v301_v23  ;;  %v1400_v23 = vld [vmem:[%s2256_s2 + $0x220] sm:$0xff] }
  0x1f   : > { %430 = vmatpush.msra.mxu2 %v1379_v52  ;;  %v561_v52 = vld [vmem:[%s2257_s3 + $0x50] sm:$0xff] }
  0x20   : > { %261 = vmatpush.msra.mxu0 %v209_v10  ;;  %345 = vmatpush.msra.mxu1 %v300_v24 }
  0x21   : > { %431 = vmatpush.msra.mxu2 %v1378_v53  ;;  %v560_v53 = vld [vmem:[%s2257_s3 + $0x48] sm:$0xff] }
  0x22   : > { %262 = vmatpush.msra.mxu0 %v208_v11  ;;  %346 = vmatpush.msra.mxu1 %v299_v26  ;;  %v1398_v26 = vld [vmem:[%s2256_s2 + $0x210] sm:$0xff] }
  0x23   : > { %1356 = vmatmul.msk.f32.vlgmr.msra.gmra.mxu0 %vm222_vm0, %v200_v12  ;;  %432 = vmatpush.msra.mxu2 %v1377_v54  ;;  %v559_v54 = vld [vmem:[%s2257_s3 + $0x40] sm:$0xff] }
  0x24   : > { %347 = vmatpush.msra.mxu1 %v298_v29 }
  0x25   : > { %433 = vmatpush.msra.mxu2 %v1376_v57  ;;  %v558_v57 = vld [vmem:[%s2257_s3 + $0x38] sm:$0xff] }
  0x26   : > { %348 = vmatpush.msra.mxu1 %v297_v30  ;;  %v1396_v30 = vld [vmem:[%s2256_s2 + $0x200] sm:$0xff] }
  0x27   : > { %434 = vmatpush.msra.mxu2 %v1375_v59  ;;  %v556_v59 = vld [vmem:[%s2257_s3 + $0x28] sm:$0xff] }
  0x28   : > { %349 = vmatpush.msra.mxu1 %v296_v31 }
  0x29   : > { %435 = vmatpush.msra.mxu2 %v1374_v2 }
  0x2b   : > { %1357 = vmatmul.msk.f32.gmra.mxu0 %vm222_vm0, %v201_v13  ;;  %436 = vmatpush.msra.mxu2 %v1373_v3 }
  0x2d   : > { %437 = vmatpush.msra.mxu2 %v1372_v4 }
  0x33   : > { %1358 = vmatmul.msk.f32.gmra.mxu0 %vm222_vm0, %v202_v14 }
  0x3b   : > { %1359 = vmatmul.msk.f32.gmra.mxu0 %vm222_vm0, %v203_v15 }
  0x43   : > { %1360 = vmatmul.msk.f32.gmra.mxu0 %vm222_vm0, %v204_v20  ;;  %v1401_v20 = vld [vmem:[%s2256_s2 + $0x228] sm:$0xff] }
  0x44   : > { %508 = vmatpush.msra.mxu3 %v1401_v20 }
  0x46   : > { %509 = vmatpush.msra.mxu3 %v1400_v23 }
  0x4b   : > { %1361 = vmatmul.msk.f32.gmra.mxu0 %vm222_vm0, %v205_v25  ;;  %v1399_v25 = vld [vmem:[%s2256_s2 + $0x218] sm:$0xff] }
  0x4c   : > { %510 = vmatpush.msra.mxu3 %v1399_v25 }
  0x4e   : > { %511 = vmatpush.msra.mxu3 %v1398_v26 }
  0x53   : > { %1362 = vmatmul.msk.f32.gmra.mxu0 %vm222_vm0, %v206_v27  ;;  %v1397_v27 = vld [vmem:[%s2256_s2 + $0x208] sm:$0xff] }
  0x54   : > { %512 = vmatpush.msra.mxu3 %v1397_v27 }
  0x56   : > { %513 = vmatpush.msra.mxu3 %v1396_v30 }
  0x5b   : > { %1363 = vmatmul.msk.f32.gmra.mxu0 %vm222_vm0, %v207_v28 }
  0xa0   : > { %v264_v33 = vpop.f32.mrf.mxu0 }
  0xa1   : > { %v265_v34 = vadd.f32 %v1512_v32, %v264_v33  ;;  %v1394_v33 = vld [vmem:[%s2256_s2 + $0x1f0] sm:$0xff] }
  0xa3   : > { %v288_v35 = vmax.f32 %v265_v34, 0.0 }
  0xa5   : > { %1364 = vmatmul.msk.f32.vlgmr.msra.gmra.mxu1 %vm222_vm0, %v288_v35 }
  0xa8   : > { %v267_v36 = vpop.f32.mrf.mxu0 }
  0xa9   : > { %v268_v37 = vadd.f32 %v1512_v32, %v267_v36 }
  0xab   : > { %v289_v38 = vmax.f32 %v268_v37, 0.0 }
  0xad   : > { %1365 = vmatmul.msk.f32.gmra.mxu1 %vm222_vm0, %v289_v38 }
  0xb0   : > { %v270_v39 = vpop.f32.mrf.mxu0 }
  0xb1   : > { %v271_v40 = vadd.f32 %v1512_v32, %v270_v39 }
  0xb3   : > { %v290_v41 = vmax.f32 %v271_v40, 0.0  ;;  %v1393_v40 = vld [vmem:[%s2256_s2 + $0x1e8] sm:$0xff] }
  0xb5   : > { %1366 = vmatmul.msk.f32.gmra.mxu1 %vm222_vm0, %v290_v41  ;;  %v1392_v41 = vld [vmem:[%s2256_s2 + $0x1e0] sm:$0xff] }
  0xb8   : > { %v273_v42 = vpop.f32.mrf.mxu0 }
  0xb9   : > { %v274_v43 = vadd.f32 %v1512_v32, %v273_v42  ;;  %v1514_v42 = vld [vmem:[%s2257_s3 + $0x158] ss:$0 sm:$0xff] }
  0xbb   : > { %v291_v44 = vmax.f32 %v274_v43, 0.0 }
  0xbd   : > { %1367 = vmatmul.msk.f32.gmra.mxu1 %vm222_vm0, %v291_v44 }
  0xc0   : > { %v276_v48 = vpop.f32.mrf.mxu0 }
  0xc1   : > { %v277_v49 = vadd.f32 %v1512_v32, %v276_v48 }
  0xc3   : > { %v292_v51 = vmax.f32 %v277_v49, 0.0 }
  0xc5   : > { %1368 = vmatmul.msk.f32.gmra.mxu1 %vm222_vm0, %v292_v51  ;;  %v562_v51 = vld [vmem:[%s2257_s3 + $0x58] sm:$0xff] }
  0xc6   : > { %591 = vmatpush.msrb.mxu0 %v562_v51 }
  0xc8   : > { %v279_v55 = vpop.f32.mrf.mxu0  ;;  %592 = vmatpush.msrb.mxu0 %v561_v52 }
  0xc9   : > { %v280_v56 = vadd.f32 %v1512_v32, %v279_v55 }
  0xca   : > { %593 = vmatpush.msrb.mxu0 %v560_v53 }
  0xcb   : > { %v293_v58 = vmax.f32 %v280_v56, 0.0 }
  0xcc   : > { %594 = vmatpush.msrb.mxu0 %v559_v54 }
  0xcd   : > { %1369 = vmatmul.msk.f32.gmra.mxu1 %vm222_vm0, %v293_v58  ;;  %v557_v58 = vld [vmem:[%s2257_s3 + $0x30] sm:$0xff] }
  0xce   : > { %595 = vmatpush.msrb.mxu0 %v558_v57 }
  0xd0   : > { %v282_v60 = vpop.f32.mrf.mxu0  ;;  %596 = vmatpush.msrb.mxu0 %v557_v58 }
  0xd1   : > { %v283_v61 = vadd.f32 %v1512_v32, %v282_v60  ;;  %v555_v60 = vld [vmem:[%s2257_s3 + $0x20] sm:$0xff] }
  0xd2   : > { %597 = vmatpush.msrb.mxu0 %v556_v59 }
  0xd3   : > { %v294_v62 = vmax.f32 %v283_v61, 0.0 }
  0xd4   : > { %598 = vmatpush.msrb.mxu0 %v555_v60 }
  0xd5   : > { %1370 = vmatmul.msk.f32.gmra.mxu1 %vm222_vm0, %v294_v62 }
  0xd8   : > { %v285_v63 = vpop.f32.mrf.mxu0 }
  0xd9   : > { %v286_v0 = vadd.f32 %v1512_v32, %v285_v63  ;;  %v1395_v32 = vld [vmem:[%s2256_s2 + $0x1f8] sm:$0xff] }
  0xda   : > { %514 = vmatpush.msra.mxu3 %v1395_v32  ;;  %v554_v63 = vld [vmem:[%s2257_s3 + $0x18] sm:$0xff] }
  0xdb   : > { %v295_v1 = vmax.f32 %v286_v0, 0.0  ;;  %v553_v0 = vld [vmem:[%s2257_s3 + $0x10] sm:$0xff]  ;;  %599 = vmatpush.msrb.mxu0 %v554_v63 }
  0xdc   : > { %515 = vmatpush.msra.mxu3 %v1394_v33 }
  0xdd   : > { %1371 = vmatmul.msk.f32.gmra.mxu1 %vm222_vm0, %v295_v1  ;;  %600 = vmatpush.msrb.mxu0 %v553_v0 }
  0xde   : > { %516 = vmatpush.msra.mxu3 %v1393_v40 }
  0xe0   : > { %517 = vmatpush.msra.mxu3 %v1392_v41 }
 0x122   : > { %v351_v6 = vpop.f32.mrf.mxu1 }
 0x123   : > { %v352_v7 = vadd.f32 %v1513_v5, %v351_v6  ;;  %v551_v6 = vld [vmem:[%s2257_s3] sm:$0xff] }
 0x125   : > { %v375_v8 = vmax.f32 %v352_v7, 0.0  ;;  %v1515_v7 = vld [vmem:[%s2257_s3 + $0x160] ss:$0 sm:$0xff] }
 0x127   : > { %1384 = vmatmul.msk.f32.vlgmr.msra.gmra.mxu2 %vm222_vm0, %v375_v8 }
 0x12a   : > { %v354_v9 = vpop.f32.mrf.mxu1 }
 0x12b   : > { %v355_v10 = vadd.f32 %v1513_v5, %v354_v9 }
 0x12d   : > { %v376_v11 = vmax.f32 %v355_v10, 0.0 }
 0x12f   : > { %1385 = vmatmul.msk.f32.gmra.mxu2 %vm222_vm0, %v376_v11 }
 0x132   : > { %v357_v12 = vpop.f32.mrf.mxu1 }
 0x133   : > { %v358_v13 = vadd.f32 %v1513_v5, %v357_v12 }
 0x135   : > { %v377_v14 = vmax.f32 %v358_v13, 0.0 }
 0x137   : > { %1386 = vmatmul.msk.f32.gmra.mxu2 %vm222_vm0, %v377_v14 }
 0x13a   : > { %v360_v15 = vpop.f32.mrf.mxu1 }
 0x13b   : > { %v361_v16 = vadd.f32 %v1513_v5, %v360_v15 }
 0x13d   : > { %v378_v17 = vmax.f32 %v361_v16, 0.0 }
 0x13f   : > { %1387 = vmatmul.msk.f32.gmra.mxu2 %vm222_vm0, %v378_v17 }
 0x142   : > { %v363_v21 = vpop.f32.mrf.mxu1 }
 0x143   : > { %v364_v22 = vadd.f32 %v1513_v5, %v363_v21 }
 0x145   : > { %v379_v24 = vmax.f32 %v364_v22, 0.0  ;;  %v1890_v22 = vld [vmem:[%s2257_s3 + $0xc0] sm:$0x7] }
 0x146   : > { %1420 = vmatpush.msk.msrb.mxu1 %vm806_vm1, %v1890_v22 }
 0x147   : > { %1388 = vmatmul.msk.f32.gmra.mxu2 %vm222_vm0, %v379_v24 }
 0x14a   : > { %v366_v28 = vpop.f32.mrf.mxu1 }
 0x14b   : > { %v367_v29 = vadd.f32 %v1513_v5, %v366_v28 }
 0x14d   : > { %v380_v31 = vmax.f32 %v367_v29, 0.0 }
 0x14f   : > { %1389 = vmatmul.msk.f32.gmra.mxu2 %vm222_vm0, %v380_v31 }
 0x152   : > { %v369_v34 = vpop.f32.mrf.mxu1 }
 0x153   : > { %v370_v35 = vadd.f32 %v1513_v5, %v369_v34 }
 0x155   : > { %v381_v36 = vmax.f32 %v370_v35, 0.0 }
 0x157   : > { %1390 = vmatmul.msk.f32.gmra.mxu2 %vm222_vm0, %v381_v36 }
 0x15a   : > { %v372_v37 = vpop.f32.mrf.mxu1 }
 0x15b   : > { %v373_v38 = vadd.f32 %v1513_v5, %v372_v37  ;;  %v552_v5 = vld [vmem:[%s2257_s3 + $0x8] sm:$0xff] }
 0x15c   : > { %601 = vmatpush.msrb.mxu0 %v552_v5 }
 0x15d   : > { %v382_v39 = vmax.f32 %v373_v38, 0.0 }
 0x15e   : > { %602 = vmatpush.msrb.mxu0 %v551_v6 }
 0x15f   : > { %1391 = vmatmul.msk.f32.gmra.mxu2 %vm222_vm0, %v382_v39 }
 0x1aa   : > { %v439_v43 = vpop.f32.mrf.mxu2 }
 0x1ab   : > { %v1812_v44 = vadd.f32 %v1514_v42, %v439_v43 }
 0x1ad   : > { %1404 = vmatmul.msk.f32.vlgmr.msra.gmra.mxu3 %vm222_vm0, %v1812_v44 }
 0x1b2   : > { %v442_v45 = vpop.f32.mrf.mxu2 }
 0x1b3   : > { %v1816_v46 = vadd.f32 %v1514_v42, %v442_v45 }
 0x1b5   : > { %1405 = vmatmul.msk.f32.gmra.mxu3 %vm222_vm0, %v1816_v46 }
 0x1ba   : > { %v445_v47 = vpop.f32.mrf.mxu2 }
 0x1bb   : > { %v1820_v48 = vadd.f32 %v1514_v42, %v445_v47 }
 0x1bd   : > { %1406 = vmatmul.msk.f32.gmra.mxu3 %vm222_vm0, %v1820_v48 }
 0x1c2   : > { %v448_v49 = vpop.f32.mrf.mxu2 }
 0x1c3   : > { %v1824_v50 = vadd.f32 %v1514_v42, %v448_v49 }
 0x1c5   : > { %1407 = vmatmul.msk.f32.gmra.mxu3 %vm222_vm0, %v1824_v50 }
 0x1ca   : > { %v451_v55 = vpop.f32.mrf.mxu2 }
 0x1cb   : > { %v1840_v56 = vadd.f32 %v1514_v42, %v451_v55 }
 0x1cd   : > { %1408 = vmatmul.msk.f32.gmra.mxu3 %vm222_vm0, %v1840_v56 }
 0x1d2   : > { %v454_v61 = vpop.f32.mrf.mxu2 }
 0x1d3   : > { %v1856_v62 = vadd.f32 %v1514_v42, %v454_v61 }
 0x1d5   : > { %1409 = vmatmul.msk.f32.gmra.mxu3 %vm222_vm0, %v1856_v62 }
 0x1da   : > { %v457_v1 = vpop.f32.mrf.mxu2 }
 0x1db   : > { %v1866_v2 = vadd.f32 %v1514_v42, %v457_v1 }
 0x1dd   : > { %1410 = vmatmul.msk.f32.gmra.mxu3 %vm222_vm0, %v1866_v2 }
 0x1e2   : > { %v460_v3 = vpop.f32.mrf.mxu2 }
 0x1e3   : > { %v1870_v4 = vadd.f32 %v1514_v42, %v460_v3 }
 0x1e5   : > { %1411 = vmatmul.msk.f32.gmra.mxu3 %vm222_vm0, %v1870_v4 }
 0x230   : > { %v519_v8 = vpop.f32.mrf.mxu3 }
 0x231   : > { %v520_v9 = vadd.f32 %v1515_v7, %v519_v8 }
 0x233   : > { %1522 = vtanh.f32 %v520_v9 }
 0x238   : > { %v522_v10 = vpop.f32.mrf.mxu3 }
 0x239   : > { %v1523_v11 = vpop.eup %1522  ;;  %v523_v12 = vadd.f32 %v1515_v7, %v522_v10 }
 0x23a   : > { %1412 = vmatmul.msk.f32.vlgmr.msrb.gmra.mxu0 %vm222_vm0, %v1523_v11 }
 0x23b   : > { %1524 = vtanh.f32 %v523_v12 }
 0x240   : > { %v525_v13 = vpop.f32.mrf.mxu3 }
 0x241   : > { %v1525_v14 = vpop.eup %1524  ;;  %v526_v15 = vadd.f32 %v1515_v7, %v525_v13 }
 0x242   : > { %1413 = vmatmul.msk.f32.gmra.mxu0 %vm222_vm0, %v1525_v14 }
 0x243   : > { %1526 = vtanh.f32 %v526_v15 }
 0x248   : > { %v528_v16 = vpop.f32.mrf.mxu3 }
 0x249   : > { %v1527_v17 = vpop.eup %1526  ;;  %v529_v18 = vadd.f32 %v1515_v7, %v528_v16 }
 0x24a   : > { %1414 = vmatmul.msk.f32.gmra.mxu0 %vm222_vm0, %v1527_v17 }
 0x24b   : > { %1528 = vtanh.f32 %v529_v18 }
 0x250   : > { %v531_v19 = vpop.f32.mrf.mxu3 }
 0x251   : > { %v1529_v20 = vpop.eup %1528  ;;  %v532_v21 = vadd.f32 %v1515_v7, %v531_v19 }
 0x252   : > { %1415 = vmatmul.msk.f32.gmra.mxu0 %vm222_vm0, %v1529_v20 }
 0x253   : > { %1530 = vtanh.f32 %v532_v21 }
 0x258   : > { %v534_v23 = vpop.f32.mrf.mxu3 }
 0x259   : > { %v1531_v24 = vpop.eup %1530  ;;  %v535_v25 = vadd.f32 %v1515_v7, %v534_v23 }
 0x25a   : > { %1416 = vmatmul.msk.f32.gmra.mxu0 %vm222_vm0, %v1531_v24 }
 0x25b   : > { %1532 = vtanh.f32 %v535_v25 }
 0x260   : > { %v537_v26 = vpop.f32.mrf.mxu3 }
 0x261   : > { %v1533_v27 = vpop.eup %1532  ;;  %v538_v28 = vadd.f32 %v1515_v7, %v537_v26 }
 0x262   : > { %1417 = vmatmul.msk.f32.gmra.mxu0 %vm222_vm0, %v1533_v27 }
 0x263   : > { %1534 = vtanh.f32 %v538_v28 }
 0x268   : > { %v540_v29 = vpop.f32.mrf.mxu3 }
 0x269   : > { %v1535_v30 = vpop.eup %1534  ;;  %v541_v31 = vadd.f32 %v1515_v7, %v540_v29 }
 0x26a   : > { %1418 = vmatmul.msk.f32.gmra.mxu0 %vm222_vm0, %v1535_v30 }
 0x26b   : > { %1536 = vtanh.f32 %v541_v31 }
 0x271   : > { %v1537_v32 = vpop.eup %1536 }
 0x272   : > { %1419 = vmatmul.msk.f32.gmra.mxu0 %vm222_vm0, %v1537_v32 }
 0x2b7   : > { %v604_v33 = vpop.f32.mrf.mxu0 }
 0x2b8   : > { %v629_v34 = vsel %vm628_vm2, %v604_v33, -inf }
 0x2b9   : > { %v630_v35 = vrot.slane %v629_v34, 4 }
 0x2bb   : > { %v631_v36 = vmax.f32 %v629_v34, %v630_v35 }
 0x2bd   : > { %v632_v37 = vrot.slane %v631_v36, 2 }
 0x2bf   : > { %v633_v38 = vmax.f32 %v631_v36, %v632_v37  ;;  %v607_v39 = vpop.f32.mrf.mxu0 }
 0x2c0   : > { %v636_v40 = vsel %vm628_vm2, %v607_v39, -inf }
 0x2c1   : > { %v634_v41 = vrot.slane %v633_v38, 1  ;;  %v637_v42 = vrot.slane %v636_v40, 4 }
 0x2c3   : > { %v635_v43 = vmax.f32 %v633_v38, %v634_v41  ;;  %v638_v45 = vmax.f32 %v636_v40, %v637_v42 }
 0x2c5   : > { %v685_v47 = vsub.f32 %v604_v33, %v635_v43  ;;  %v639_v49 = vrot.slane %v638_v45, 2 }
 0x2c7   : > { %v693_v51 = vmul.f32 1.442695, %v685_v47  ;;  %v640_v52 = vmax.f32 %v638_v45, %v639_v49  ;;  %v610_v53 = vpop.f32.mrf.mxu0 }
 0x2c8   : > { %v643_v54 = vsel %vm628_vm2, %v610_v53, -inf }
 0x2c9   : > { %1538 = vpow2.f32 %v693_v51  ;;  %v641_v55 = vrot.slane %v640_v52, 1  ;;  %v644_v57 = vrot.slane %v643_v54, 4 }
 0x2cb   : > { %v642_v58 = vmax.f32 %v640_v52, %v641_v55  ;;  %v645_v59 = vmax.f32 %v643_v54, %v644_v57 }
 0x2cd   : > { %v686_v60 = vsub.f32 %v607_v39, %v642_v58  ;;  %v646_v61 = vrot.slane %v645_v59, 2 }
 0x2cf   : > { %v1539_v63 = vpop.eup %1538  ;;  %v695_v0 = vmul.f32 1.442695, %v686_v60  ;;  %v647_v1 = vmax.f32 %v645_v59, %v646_v61  ;;  %v613_v3 = vpop.f32.mrf.mxu0 }
 0x2d0   : > { %v709_v5 = vsel %vm628_vm2, %v1539_v63, 0.0  ;;  %v650_v6 = vsel %vm628_vm2, %v613_v3, -inf }
 0x2d1   : > { %v710_v7 = vrot.slane %v709_v5, 4  ;;  %1540 = vpow2.f32 %v695_v0  ;;  %v648_v8 = vrot.slane %v647_v1, 1  ;;  %v651_v9 = vrot.slane %v650_v6, 4 }
 0x2d3   : > { %v711_v10 = vadd.f32 %v710_v7, %v709_v5  ;;  %v649_v11 = vmax.f32 %v647_v1, %v648_v8  ;;  %v652_v12 = vmax.f32 %v650_v6, %v651_v9 }
 0x2d5   : > { %v712_v13 = vrot.slane %v711_v10, 2  ;;  %v687_v14 = vsub.f32 %v610_v53, %v649_v11  ;;  %v653_v15 = vrot.slane %v652_v12, 2 }
 0x2d7   : > { %v1541_v16 = vpop.eup %1540  ;;  %v713_v17 = vadd.f32 %v712_v13, %v711_v10  ;;  %v697_v18 = vmul.f32 1.442695, %v687_v14  ;;  %v654_v19 = vmax.f32 %v652_v12, %v653_v15  ;;  %v616_v20 = vpop.f32.mrf.mxu0 }
 0x2d8   : > { %v716_v21 = vsel %vm628_vm2, %v1541_v16, 0.0  ;;  %v657_v23 = vsel %vm628_vm2, %v616_v20, -inf }
 0x2d9   : > { %v714_v24 = vrot.slane %v713_v17, 1  ;;  %v717_v25 = vrot.slane %v716_v21, 4  ;;  %1542 = vpow2.f32 %v697_v18  ;;  %v655_v26 = vrot.slane %v654_v19, 1 }
 0x2da   : > { %v658_v27 = vrot.slane %v657_v23, 4 }
 0x2db   : > { %v715_v28 = vadd.f32 %v714_v24, %v713_v17  ;;  %v718_v29 = vadd.f32 %v717_v25, %v716_v21  ;;  %v656_v30 = vmax.f32 %v654_v19, %v655_v26 }
 0x2dc   : > { %v659_v31 = vmax.f32 %v657_v23, %v658_v27 }
 0x2dd   : > { %v719_v32 = vrot.slane %v718_v29, 2  ;;  %v688_v33 = vsub.f32 %v613_v3, %v656_v30  ;;  %1544 = vrcp.f32 %v715_v28 }
 0x2de   : > { %v660_v34 = vrot.slane %v659_v31, 2 }
 0x2df   : > { %v1543_v35 = vpop.eup %1542  ;;  %v720_v36 = vadd.f32 %v719_v32, %v718_v29  ;;  %v699_v37 = vmul.f32 1.442695, %v688_v33  ;;  %v619_v38 = vpop.f32.mrf.mxu0 }
 0x2e0   : > { %v723_v39 = vsel %vm628_vm2, %v1543_v35, 0.0  ;;  %v661_v40 = vmax.f32 %v659_v31, %v660_v34  ;;  %v664_v41 = vsel %vm628_vm2, %v619_v38, -inf }
 0x2e1   : > { %v724_v42 = vrot.slane %v723_v39, 4  ;;  %1546 = vpow2.f32 %v699_v37  ;;  %v665_v43 = vrot.slane %v664_v41, 4  ;;  %v721_v45 = vrot.slane %v720_v36, 1 }
 0x2e2   : > { %v662_v47 = vrot.slane %v661_v40, 1 }
 0x2e3   : > { %v1545_v49 = vpop.eup %1544  ;;  %v725_v51 = vadd.f32 %v724_v42, %v723_v39  ;;  %v666_v52 = vmax.f32 %v664_v41, %v665_v43  ;;  %v722_v53 = vadd.f32 %v721_v45, %v720_v36 }
 0x2e4   : > { %v663_v54 = vmax.f32 %v661_v40, %v662_v47  ;;  %v773_v55 = vmul.f32 %v1545_v49, %v1539_v63 }
 0x2e5   : > { %v726_v57 = vrot.slane %v725_v51, 2  ;;  %v667_v58 = vrot.slane %v666_v52, 2  ;;  %1548 = vrcp.f32 %v722_v53 }
 0x2e6   : > { %v689_v59 = vsub.f32 %v616_v20, %v663_v54  ;;  %1421 = vmatmul.msk.f32.vlgmr.msrb.gmra.mxu1 %vm628_vm2, %v773_v55 }
 0x2e7   : > { %v1547_v60 = vpop.eup %1546  ;;  %v727_v61 = vadd.f32 %v726_v57, %v725_v51  ;;  %v668_v0 = vmax.f32 %v666_v52, %v667_v58  ;;  %v622_v1 = vpop.f32.mrf.mxu0 }
 0x2e8   : > { %v730_v3 = vsel %vm628_vm2, %v1547_v60, 0.0  ;;  %v701_v5 = vmul.f32 1.442695, %v689_v59  ;;  %v671_v6 = vsel %vm628_vm2, %v622_v1, -inf }
 0x2e9   : > { %v731_v7 = vrot.slane %v730_v3, 4  ;;  %v669_v8 = vrot.slane %v668_v0, 1  ;;  %v672_v9 = vrot.slane %v671_v6, 4  ;;  %v728_v10 = vrot.slane %v727_v61, 1 }
 0x2ea   : > { %1550 = vpow2.f32 %v701_v5 }
 0x2eb   : > { %v1549_v63 = vpop.eup %1548  ;;  %v732_v11 = vadd.f32 %v731_v7, %v730_v3  ;;  %v670_v12 = vmax.f32 %v668_v0, %v669_v8  ;;  %v673_v13 = vmax.f32 %v671_v6, %v672_v9  ;;  %v729_v14 = vadd.f32 %v728_v10, %v727_v61 }
 0x2ec   : > { %v774_v15 = vmul.f32 %v1549_v63, %v1541_v16 }
 0x2ed   : > { %v733_v17 = vrot.slane %v732_v11, 2  ;;  %v690_v18 = vsub.f32 %v619_v38, %v670_v12  ;;  %v674_v19 = vrot.slane %v673_v13, 2  ;;  %1552 = vrcp.f32 %v729_v14 }
 0x2ee   : > { %1422 = vmatmul.msk.f32.gmra.mxu1 %vm628_vm2, %v774_v15 }
 0x2ef   : > { %v734_v20 = vadd.f32 %v733_v17, %v732_v11  ;;  %v703_v21 = vmul.f32 1.442695, %v690_v18  ;;  %v675_v23 = vmax.f32 %v673_v13, %v674_v19  ;;  %v625_v24 = vpop.f32.mrf.mxu0 }
 0x2f0   : > { %v1551_v25 = vpop.eup %1550  ;;  %v678_v26 = vsel %vm628_vm2, %v625_v24, -inf }
 0x2f1   : > { %v737_v27 = vsel %vm628_vm2, %v1551_v25, 0.0  ;;  %1554 = vpow2.f32 %v703_v21  ;;  %v676_v28 = vrot.slane %v675_v23, 1  ;;  %v679_v29 = vrot.slane %v678_v26, 4 }
 0x2f2   : > { %v738_v30 = vrot.slane %v737_v27, 4  ;;  %v735_v16 = vrot.slane %v734_v20, 1 }
 0x2f3   : > { %v1553_v31 = vpop.eup %1552  ;;  %v677_v32 = vmax.f32 %v675_v23, %v676_v28  ;;  %v680_v33 = vmax.f32 %v678_v26, %v679_v29  ;;  %v1440_v29 = vld [vmem:[%s2256_s2 + $0x298] sm:$0xff] }
 0x2f4   : > { %v739_v34 = vadd.f32 %v738_v30, %v737_v27  ;;  %v775_v36 = vmul.f32 %v1553_v31, %v1543_v35  ;;  %v736_v37 = vadd.f32 %v735_v16, %v734_v20  ;;  %v1439_v30 = vld [vmem:[%s2256_s2 + $0x290] sm:$0xff]  ;;  %958 = vmatpush.msrb.mxu2 %v1440_v29  ;;  %v1438_v31 = vld [vmem:[%s2256_s2 + $0x288] sm:$0xff]  ;;  %v978_v29 = vld [vmem:[%s2257_s3 + $0x78] sm:$0xff] }
 0x2f5   : > { %v691_v38 = vsub.f32 %v622_v1, %v677_v32  ;;  %v681_v39 = vrot.slane %v680_v33, 2 }
 0x2f6   : > { %v740_v40 = vrot.slane %v739_v34, 2  ;;  %1423 = vmatmul.msk.f32.gmra.mxu1 %vm628_vm2, %v775_v36  ;;  %1556 = vrcp.f32 %v736_v37  ;;  %959 = vmatpush.msrb.mxu2 %v1439_v30  ;;  %v1435_v36 = vld [vmem:[%s2256_s2 + $0x270] sm:$0xff] }
 0x2f7   : > { %v1555_v41 = vpop.eup %1554  ;;  %v705_v42 = vmul.f32 1.442695, %v691_v38  ;;  %v682_v43 = vmax.f32 %v680_v33, %v681_v39  ;;  %v1437_v33 = vld [vmem:[%s2256_s2 + $0x280] sm:$0xff]  ;;  %v1434_v38 = vld [vmem:[%s2256_s2 + $0x268] sm:$0xff] }
 0x2f8   : > { %v741_v45 = vadd.f32 %v740_v40, %v739_v34  ;;  %v744_v47 = vsel %vm628_vm2, %v1555_v41, 0.0  ;;  %960 = vmatpush.msrb.mxu2 %v1438_v31  ;;  %v1436_v34 = vld [vmem:[%s2256_s2 + $0x278] sm:$0xff]  ;;  %v1433_v39 = vld [vmem:[%s2256_s2 + $0x260] sm:$0xff] }
 0x2f9   : > { %v745_v49 = vrot.slane %v744_v47, 4  ;;  %1558 = vpow2.f32 %v705_v42  ;;  %v683_v51 = vrot.slane %v682_v43, 1 }
 0x2fa   : > { %v742_v52 = vrot.slane %v741_v45, 1  ;;  %961 = vmatpush.msrb.mxu2 %v1437_v33 }
 0x2fb   : > { %v746_v53 = vadd.f32 %v745_v49, %v744_v47  ;;  %v684_v54 = vmax.f32 %v682_v43, %v683_v51 }
 0x2fc   : > { %v1557_v35 = vpop.eup %1556  ;;  %v743_v55 = vadd.f32 %v742_v52, %v741_v45  ;;  %962 = vmatpush.msrb.mxu2 %v1436_v34  ;;  %v1431_v45 = vld [vmem:[%s2256_s2 + $0x250] sm:$0xff]  ;;  %v1430_v52 = vld [vmem:[%s2256_s2 + $0x248] sm:$0xff] }
 0x2fd   : > { %v747_v57 = vrot.slane %v746_v53, 2  ;;  %v692_v58 = vsub.f32 %v625_v24, %v684_v54  ;;  %v776_v59 = vmul.f32 %v1557_v35, %v1547_v60 }
 0x2fe   : > { %1560 = vrcp.f32 %v743_v55  ;;  %963 = vmatpush.msrb.mxu2 %v1435_v36  ;;  %v977_v36 = vld [vmem:[%s2257_s3 + $0x70] sm:$0xff] }
 0x2ff   : > { %v1559_v61 = vpop.eup %1558  ;;  %v748_v0 = vadd.f32 %v747_v57, %v746_v53  ;;  %v707_v1 = vmul.f32 1.442695, %v692_v58  ;;  %1424 = vmatmul.msk.f32.gmra.mxu1 %vm628_vm2, %v776_v59  ;;  %v985_v57 = vld [vmem:[%s2257_s3 + $0xb0] sm:$0xff] }
 0x300   : > { %v751_v3 = vsel %vm628_vm2, %v1559_v61, 0.0  ;;  %964 = vmatpush.msrb.mxu2 %v1434_v38 }
 0x301   : > { %v752_v5 = vrot.slane %v751_v3, 4  ;;  %1562 = vpow2.f32 %v707_v1  ;;  %v749_v6 = vrot.slane %v748_v0, 1 }
 0x302   : > { %965 = vmatpush.msrb.mxu2 %v1433_v39 }
 0x303   : > { %v753_v7 = vadd.f32 %v752_v5, %v751_v3  ;;  %v750_v8 = vadd.f32 %v749_v6, %v748_v0  ;;  %v983_v6 = vld [vmem:[%s2257_s3 + $0xa0] sm:$0xff] }
 0x304   : > { %v1561_v9 = vpop.eup %1560 }
 0x305   : > { %v754_v10 = vrot.slane %v753_v7, 2  ;;  %v777_v63 = vmul.f32 %v1561_v9, %v1551_v25  ;;  %1564 = vrcp.f32 %v750_v8  ;;  %v982_v9 = vld [vmem:[%s2257_s3 + $0x98] sm:$0xff] }
 0x307   : > { %v1563_v11 = vpop.eup %1562  ;;  %v755_v12 = vadd.f32 %v754_v10, %v753_v7  ;;  %1425 = vmatmul.msk.f32.gmra.mxu1 %vm628_vm2, %v777_v63 }
 0x308   : > { %v758_v60 = vsel %vm628_vm2, %v1563_v11, 0.0 }
 0x309   : > { %v759_v13 = vrot.slane %v758_v60, 4  ;;  %v756_v14 = vrot.slane %v755_v12, 1 }
 0x30b   : > { %v1565_v15 = vpop.eup %1564  ;;  %v760_v17 = vadd.f32 %v759_v13, %v758_v60  ;;  %v757_v18 = vadd.f32 %v756_v14, %v755_v12  ;;  %v981_v13 = vld [vmem:[%s2257_s3 + $0x90] sm:$0xff] }
 0x30c   : > { %v778_v19 = vmul.f32 %v1565_v15, %v1555_v41  ;;  %v1432_v41 = vld [vmem:[%s2256_s2 + $0x258] sm:$0xff] }
 0x30d   : > { %v761_v20 = vrot.slane %v760_v17, 2  ;;  %1566 = vrcp.f32 %v757_v18  ;;  %966 = vmatpush.msrb.mxu2 %v1432_v41 }
 0x30f   : > { %v762_v21 = vadd.f32 %v761_v20, %v760_v17  ;;  %1426 = vmatmul.msk.f32.gmra.mxu1 %vm628_vm2, %v778_v19  ;;  %967 = vmatpush.msrb.mxu2 %v1431_v45  ;;  %v980_v19 = vld [vmem:[%s2257_s3 + $0x88] sm:$0xff] }
 0x311   : > { %v763_v23 = vrot.slane %v762_v21, 1  ;;  %968 = vmatpush.msrb.mxu2 %v1430_v52 }
 0x313   : > { %v1567_v24 = vpop.eup %1566  ;;  %v764_v25 = vadd.f32 %v763_v23, %v762_v21 }
 0x314   : > { %v779_v26 = vmul.f32 %v1567_v24, %v1559_v61 }
 0x315   : > { %1568 = vrcp.f32 %v764_v25 }
 0x317   : > { %1427 = vmatmul.msk.f32.gmra.mxu1 %vm628_vm2, %v779_v26 }
 0x31b   : > { %v1569_v27 = vpop.eup %1568 }
 0x31c   : > { %v780_v28 = vmul.f32 %v1569_v27, %v1563_v11 }
 0x31f   : > { %1428 = vmatmul.msk.f32.gmra.mxu1 %vm628_vm2, %v780_v28 }
 0x363   : > { %v827_v16 = vpop.f32.mrf.mxu1 }
 0x364   : > { %v851_v49 = vmul.f32 %v827_v16, %v1812_v44 }
 0x366   : > { %v859_v44 = vsel %vm222_vm0, %v851_v49, 0.0 }
 0x367   : > { %v860_v1 = vrot.slane %v859_v44, 4 }
 0x369   : > { %v861_v10 = vadd.f32 %v860_v1, %v859_v44 }
 0x36b   : > { %v830_v32 = vpop.f32.mrf.mxu1  ;;  %v862_v20 = vrot.slane %v861_v10, 2 }
 0x36c   : > { %v852_v43 = vmul.f32 %v830_v32, %v1816_v46  ;;  %v1429_v46 = vld [vmem:[%s2256_s2 + $0x240] sm:$0xff] }
 0x36d   : > { %969 = vmatpush.msrb.mxu2 %v1429_v46  ;;  %v863_v30 = vadd.f32 %v862_v20, %v861_v10  ;;  %v1066_v20 = vld [vmem:[%s2257_s3 + $0x100] sm:$0xff] }
 0x36e   : > { %v866_v54 = vsel %vm222_vm0, %v852_v43, 0.0 }
 0x36f   : > { %1443 = vmatpush.msk.msra.mxu2 %vm806_vm1, %v1890_v22  ;;  %v867_v58 = vrot.slane %v866_v54, 4 }
 0x371   : > { %v868_v22 = vadd.f32 %v867_v58, %v866_v54 }
 0x373   : > { %v833_v37 = vpop.f32.mrf.mxu1  ;;  %v869_v14 = vrot.slane %v868_v22, 2 }
 0x374   : > { %v853_v47 = vmul.f32 %v833_v37, %v1820_v48 }
 0x375   : > { %v870_v25 = vadd.f32 %v869_v14, %v868_v22  ;;  %v1516_v22 = vld [vmem:[%s2257_s3 + $0x168] ss:$0 sm:$0xff] }
 0x376   : > { %v873_v48 = vsel %vm222_vm0, %v853_v47, 0.0 }
 0x377   : > { %v874_v61 = vrot.slane %v873_v48, 4  ;;  %v871_v37 = vrot.slane %v870_v25, 1 }
 0x379   : > { %v875_v8 = vadd.f32 %v874_v61, %v873_v48  ;;  %v872_v49 = vadd.f32 %v871_v37, %v870_v25  ;;  %v1062_v25 = vld [vmem:[%s2257_s3 + $0xe0] sm:$0xff] }
 0x37b   : > { %v876_v17 = vrot.slane %v875_v8, 2 }
 0x37c   : > { %v836_v40 = vpop.f32.mrf.mxu1 }
 0x37d   : > { %v854_v51 = vmul.f32 %v836_v40, %v1824_v50  ;;  %v877_v28 = vadd.f32 %v876_v17, %v875_v8  ;;  %v1069_v17 = vld [vmem:[%s2257_s3 + $0x118] sm:$0xff] }
 0x37f   : > { %v880_v50 = vsel %vm222_vm0, %v854_v51, 0.0  ;;  %v878_v39 = vrot.slane %v877_v28, 1 }
 0x380   : > { %v881_v3 = vrot.slane %v880_v50, 4 }
 0x382   : > { %v882_v63 = vadd.f32 %v881_v3, %v880_v50 }
 0x384   : > { %v839_v42 = vpop.f32.mrf.mxu1  ;;  %v883_v21 = vrot.slane %v882_v63, 2 }
 0x385   : > { %v855_v53 = vmul.f32 %v839_v42, %v1840_v56  ;;  %v986_v56 = vld [vmem:[%s2257_s3 + $0xb8] sm:$0xff]  ;;  %v864_v42 = vrot.slane %v863_v30, 1 }
 0x386   : > { %994 = vmatpush.msrb.mxu3 %v986_v56  ;;  %v884_v16 = vadd.f32 %v883_v21, %v882_v63  ;;  %v1065_v21 = vld [vmem:[%s2257_s3 + $0xf8] sm:$0xff] }
 0x387   : > { %v887_v59 = vsel %vm222_vm0, %v855_v53, 0.0  ;;  %v865_v46 = vadd.f32 %v864_v42, %v863_v30  ;;  %v1095_v42 = vld [vmem:[%s2257_s3 + $0x130] sm:$0xff] }
 0x388   : > { %995 = vmatpush.msrb.mxu3 %v985_v57  ;;  %v888_v5 = vrot.slane %v887_v59, 4  ;;  %v885_v43 = vrot.slane %v884_v16, 1 }
 0x389   : > { %v939_v44 = vsel %vm938_vm3, %v872_v49, %v865_v46  ;;  %v1456_v49 = vld [vmem:[%s2256_s2 + $0x108] sm:$0xff] }
 0x38a   : > { %v889_v12 = vadd.f32 %v888_v5, %v887_v59  ;;  %v886_v54 = vadd.f32 %v885_v43, %v884_v16  ;;  %v976_v5 = vld [vmem:[%s2257_s3 + $0x68] sm:$0xff] }
 0x38b   : > { %v1094_v43 = vld [vmem:[%s2257_s3 + $0x128] sm:$0xff] }
 0x38c   : > { %v842_v35 = vpop.f32.mrf.mxu1  ;;  %v890_v24 = vrot.slane %v889_v12, 2 }
 0x38d   : > { %v856_v55 = vmul.f32 %v842_v35, %v1856_v62  ;;  %v984_v62 = vld [vmem:[%s2257_s3 + $0xa8] sm:$0xff] }
 0x38e   : > { %996 = vmatpush.msrb.mxu3 %v984_v62  ;;  %v891_v33 = vadd.f32 %v890_v24, %v889_v12 }
 0x38f   : > { %v894_v0 = vsel %vm222_vm0, %v856_v55, 0.0 }
 0x390   : > { %v895_v7 = vrot.slane %v894_v0, 4  ;;  %997 = vmatpush.msrb.mxu3 %v983_v6  ;;  %v892_v47 = vrot.slane %v891_v33, 1  ;;  %v975_v6 = vld [vmem:[%s2257_s3 + $0x60] sm:$0xff] }
 0x392   : > { %v896_v15 = vadd.f32 %v895_v7, %v894_v0  ;;  %998 = vmatpush.msrb.mxu3 %v982_v9  ;;  %v893_v35 = vadd.f32 %v892_v47, %v891_v33  ;;  %v1457_v47 = vld [vmem:[%s2256_s2 + $0x110] sm:$0xff] }
 0x394   : > { %v845_v11 = vpop.f32.mrf.mxu1  ;;  %999 = vmatpush.msrb.mxu3 %v981_v13  ;;  %v897_v26 = vrot.slane %v896_v15, 2 }
 0x395   : > { %v857_v60 = vmul.f32 %v845_v11, %v1866_v2  ;;  %v979_v2 = vld [vmem:[%s2257_s3 + $0x80] sm:$0xff] }
 0x396   : > { %1000 = vmatpush.msrb.mxu3 %v980_v19  ;;  %v898_v38 = vadd.f32 %v897_v26, %v896_v15  ;;  %v1070_v15 = vld [vmem:[%s2257_s3 + $0x120] sm:$0xff]  ;;  %v1067_v19 = vld [vmem:[%s2257_s3 + $0x108] sm:$0xff]  ;;  %v1061_v26 = vld [vmem:[%s2257_s3 + $0xd8] sm:$0xff] }
 0x397   : > { %v901_v18 = vsel %vm222_vm0, %v857_v60, 0.0 }
 0x398   : > { %v902_v23 = vrot.slane %v901_v18, 4  ;;  %1001 = vmatpush.msrb.mxu3 %v979_v2  ;;  %v899_v51 = vrot.slane %v898_v38, 1  ;;  %v1063_v2 = vld [vmem:[%s2257_s3 + $0xe8] sm:$0xff] }
 0x39a   : > { %v903_v27 = vadd.f32 %v902_v23, %v901_v18  ;;  %1002 = vmatpush.msrb.mxu3 %v978_v29  ;;  %v900_v50 = vadd.f32 %v899_v51, %v898_v38  ;;  %v1068_v18 = vld [vmem:[%s2257_s3 + $0x110] sm:$0xff]  ;;  %v1455_v51 = vld [vmem:[%s2256_s2 + $0x100] sm:$0xff] }
 0x39b   : > { %v1064_v23 = vld [vmem:[%s2257_s3 + $0xf0] sm:$0xff] }
 0x39c   : > { %v904_v31 = vrot.slane %v903_v27, 2  ;;  %v848_v32 = vpop.f32.mrf.mxu1  ;;  %1003 = vmatpush.msrb.mxu3 %v977_v36  ;;  %v1060_v38 = vld [vmem:[%s2257_s3 + $0xd0] sm:$0xff] }
 0x39d   : > { %v858_v34 = vmul.f32 %v848_v32, %v1870_v4  ;;  %v879_v4 = vadd.f32 %v878_v39, %v877_v28  ;;  %v1059_v39 = vld [vmem:[%s2257_s3 + $0xc8] sm:$0xff] }
 0x39e   : > { %v905_v40 = vadd.f32 %v904_v31, %v903_v27  ;;  %1004 = vmatpush.msrb.mxu3 %v976_v5  ;;  %v1464_v5 = vld [vmem:[%s2256_s2 + $0x140] sm:$0xff] }
 0x39f   : > { %v908_v41 = vsel %vm222_vm0, %v858_v34, 0.0  ;;  %v941_v56 = vsel %vm940_vm4, %v879_v4, %v939_v44  ;;  %v1453_v4 = vld [vmem:[%s2256_s2 + $0xf0] sm:$0xff] }
 0x3a0   : > { %v909_v45 = vrot.slane %v908_v41, 4  ;;  %v906_v53 = vrot.slane %v905_v40, 1  ;;  %v943_v58 = vsel %vm942_vm5, %v886_v54, %v941_v56  ;;  %1005 = vmatpush.msrb.mxu3 %v975_v6  ;;  %v1449_v44 = vld [vmem:[%s2256_s2 + $0xd0] sm:$0xff]  ;;  %v1471_v56 = vld [vmem:[%s2256_s2 + $0x178] sm:$0xff] }
 0x3a1   : > { %v945_v61 = vsel %vm944_vm6, %v893_v35, %v943_v58  ;;  %v1450_v35 = vld [vmem:[%s2256_s2 + $0xd8] sm:$0xff]  ;;  %v1469_v58 = vld [vmem:[%s2256_s2 + $0x168] sm:$0xff] }
 0x3a2   : > { %v910_v52 = vadd.f32 %v909_v45, %v908_v41  ;;  %v907_v57 = vadd.f32 %v906_v53, %v905_v40  ;;  %v947_v62 = vsel %vm946_vm7, %v900_v50, %v945_v61  ;;  %1078 = vmatpush.msra.mxu3 %v1070_v15  ;;  %v1097_v40 = vld [vmem:[%s2257_s3 + $0x140] sm:$0xff]  ;;  %v1096_v41 = vld [vmem:[%s2257_s3 + $0x138] sm:$0xff]  ;;  %v1452_v53 = vld [vmem:[%s2256_s2 + $0xe8] sm:$0xff] }
 0x3a3   : > { %v1458_v45 = vld [vmem:[%s2256_s2 + $0x118] sm:$0xff]  ;;  %v1448_v50 = vld [vmem:[%s2256_s2 + $0xc8] sm:$0xff] }
 0x3a4   : > { %v911_v48 = vrot.slane %v910_v52, 2  ;;  %v949_v1 = vsel %vm948_vm8, %v907_v57, %v947_v62  ;;  %1079 = vmatpush.msra.mxu3 %v1069_v17  ;;  %v1470_v57 = vld [vmem:[%s2256_s2 + $0x170] sm:$0xff]  ;;  %v1467_v61 = vld [vmem:[%s2256_s2 + $0x158] sm:$0xff] }
 0x3a5   : > { %v1466_v62 = vld [vmem:[%s2256_s2 + $0x150] sm:$0xff]  ;;  %v1463_v6 = vld [vmem:[%s2256_s2 + $0x138] sm:$0xff] }
 0x3a6   : > { %v912_v55 = vadd.f32 %v911_v48, %v910_v52  ;;  %1080 = vmatpush.msra.mxu3 %v1068_v18  ;;  %v1454_v52 = vld [vmem:[%s2256_s2 + $0xf8] sm:$0xff]  ;;  %v1451_v48 = vld [vmem:[%s2256_s2 + $0xe0] sm:$0xff]  ;;  %v1518_v17 = vld [vmem:[%s2257_s3 + $0x170] ss:$0 sm:$0xff] }
 0x3a8   : > { %v913_v59 = vrot.slane %v912_v55, 1  ;;  %1081 = vmatpush.msra.mxu3 %v1067_v19 }
 0x3aa   : > { %v914_v0 = vadd.f32 %v913_v59, %v912_v55  ;;  %1082 = vmatpush.msra.mxu3 %v1066_v20  ;;  %v1447_v55 = vld [vmem:[%s2256_s2 + $0xc0] sm:$0xff] }
 0x3ab   : > { %v1468_v59 = vld [vmem:[%s2256_s2 + $0x160] sm:$0xff] }
 0x3ac   : > { %v2006_v3 = vsel %vm950_vm9, %v914_v0, %v949_v1  ;;  %1083 = vmatpush.msra.mxu3 %v1065_v21  ;;  %v1465_v1 = vld [vmem:[%s2256_s2 + $0x148] sm:$0xff]  ;;  %v1477_v21 = vld [vmem:[%s2256_s2 + $0x1a0] sm:$0xff] }
 0x3ad   : > { %1441 = vmatmul.msk.f32.vlgmr.msrb.gmra.mxu2 %vm222_vm0, %v2006_v3 }
 0x3ae   : > { %1084 = vmatpush.msra.mxu3 %v1064_v23  ;;  %1116 = vmatpush.msrb.mxu2 %v1097_v40  ;;  %v1476_v23 = vld [vmem:[%s2256_s2 + $0x198] sm:$0xff] }
 0x3b0   : > { %1085 = vmatpush.msra.mxu3 %v1063_v2  ;;  %1117 = vmatpush.msrb.mxu2 %v1096_v41  ;;  %v1474_v2 = vld [vmem:[%s2256_s2 + $0x188] sm:$0xff] }
 0x3b2   : > { %1086 = vmatpush.msra.mxu3 %v1062_v25  ;;  %1118 = vmatpush.msrb.mxu2 %v1095_v42  ;;  %v1473_v25 = vld [vmem:[%s2256_s2 + $0x180] sm:$0xff] }
 0x3b3   : > { %v1520_v42 = vld [vmem:[%s2257_s3 + $0x180] ss:$0 sm:$0xff] }
 0x3b4   : > { %1087 = vmatpush.msra.mxu3 %v1061_v26  ;;  %1119 = vmatpush.msrb.mxu2 %v1094_v43  ;;  %v1497_v26 = vld [vmem:[%s2256_s2 + $0x2f8] sm:$0xff] }
 0x3b5   : > { %1259 = vmatpush.msra.mxu1 %v1497_v26 }
 0x3b6   : > { %1088 = vmatpush.msra.mxu3 %v1060_v38  ;;  %v1519_v38 = vld [vmem:[%s2257_s3 + $0x178] ss:$0 sm:$0xff] }
 0x3b8   : > { %1089 = vmatpush.msra.mxu3 %v1059_v39 }
 0x430   : > { %v971_v7 = vpop.f32.mrf.mxu2 }
 0x431   : > { %v972_v8 = vadd.f32 %v1516_v22, %v971_v7  ;;  %v1461_v22 = vld [vmem:[%s2256_s2 + $0x128] sm:$0xff]  ;;  %v1460_v7 = vld [vmem:[%s2256_s2 + $0x120] sm:$0xff] }
 0x433   : > { %1570 = vtanh.f32 %v972_v8  ;;  %v1484_v8 = vld [vmem:[%s2256_s2 + $0x1d8] sm:$0xff] }
 0x434   : > { %1221 = vmatpush.msra.mxu0 %v1484_v8 }
 0x439   : > { %v1571_v9 = vpop.eup %1570 }
 0x43a   : > { %1442 = vmatmul.msk.f32.vlgmr.msrb.gmra.mxu3 %vm222_vm0, %v1571_v9  ;;  %v1483_v9 = vld [vmem:[%s2256_s2 + $0x1d0] sm:$0xff] }
 0x43b   : > { %1182 = vmatpush.msrb.mxu3 %v1471_v56  ;;  %1222 = vmatpush.msra.mxu0 %v1483_v9 }
 0x43d   : > { %1183 = vmatpush.msrb.mxu3 %v1470_v57 }
 0x43f   : > { %1184 = vmatpush.msrb.mxu3 %v1469_v58 }
 0x441   : > { %1185 = vmatpush.msrb.mxu3 %v1468_v59 }
 0x443   : > { %1186 = vmatpush.msrb.mxu3 %v1467_v61 }
 0x445   : > { %1187 = vmatpush.msrb.mxu3 %v1466_v62 }
 0x447   : > { %1188 = vmatpush.msrb.mxu3 %v1465_v1 }
 0x449   : > { %1189 = vmatpush.msrb.mxu3 %v1464_v5 }
 0x44b   : > { %1190 = vmatpush.msrb.mxu3 %v1463_v6 }
 0x4bd   : > { %v1007_v10 = vpop.f32.mrf.mxu3 }
 0x4be   : > { %v1010_v63 = vsel %vm628_vm2, %v1007_v10, -inf }
 0x4bf   : > { %1011 = vmax.xlane.f32.xlu0 %v1010_v63  ;;  %v1481_v63 = vld [vmem:[%s2256_s2 + $0x1c0] sm:$0xff] }
 0x532   : > { %v1012_v11 = vpop.xlane.xlu0 %1011 }
 0x533   : > { %v1013_v12 = vsub.f32 %v1007_v10, %v1012_v11  ;;  %v1482_v10 = vld [vmem:[%s2256_s2 + $0x1c8] sm:$0xff]  ;;  %v1480_v11 = vld [vmem:[%s2256_s2 + $0x1b8] sm:$0xff] }
 0x534   : > { %1223 = vmatpush.msra.mxu0 %v1482_v10 }
 0x535   : > { %v1014_v60 = vmul.f32 1.442695, %v1013_v12  ;;  %v1479_v12 = vld [vmem:[%s2256_s2 + $0x1b0] sm:$0xff] }
 0x536   : > { %1224 = vmatpush.msra.mxu0 %v1481_v63 }
 0x537   : > { %1572 = vpow2.f32 %v1014_v60  ;;  %v1478_v60 = vld [vmem:[%s2256_s2 + $0x1a8] sm:$0xff] }
 0x538   : > { %1225 = vmatpush.msra.mxu0 %v1480_v11 }
 0x53a   : > { %1226 = vmatpush.msra.mxu0 %v1479_v12 }
 0x53c   : > { %1227 = vmatpush.msra.mxu0 %v1478_v60 }
 0x53d   : > { %v1573_v13 = vpop.eup %1572 }
 0x53e   : > { %v1016_v14 = vsel %vm628_vm2, %v1573_v13, 0.0  ;;  %1228 = vmatpush.msra.mxu0 %v1477_v21 }
 0x53f   : > { %1017 = vadd.xlane.f32.xlu0 %v1016_v14 }
 0x540   : > { %1229 = vmatpush.msra.mxu0 %v1476_v23 }
 0x5b2   : > { %v1018_v24 = vpop.xlane.xlu0 %1017 }
 0x5b3   : > { %1574 = vrcp.f32 %v1018_v24  ;;  %v1030_v30 = vand.u32 2147483648, %v1018_v24  ;;  %v1028_v31 = vand.u32 2147483647, %v1018_v24  ;;  %vm1024_vm11 = vweird.f32 %v1018_v24 }
 0x5b5   : > { %v1031_v33 = vor.u32 1.1754944e-38, %v1030_v30  ;;  %vm1029_vm13 = vcmp.eq.f32.partialorder %v1028_v31, 8.507059e+37  ;;  %v1493_v30 = vld [vmem:[%s2256_s2 + $0x2d8] sm:$0xff]  ;;  %v1491_v31 = vld [vmem:[%s2256_s2 + $0x2c8] sm:$0xff] }
 0x5b9   : > { %v1575_v27 = vpop.eup %1574 }
 0x5ba   : > { %v1020_v28 = vmul.f32 %v1575_v27, %v1018_v24  ;;  %vm1025_vm10 = vweird.f32 %v1575_v27  ;;  %v1475_v24 = vld [vmem:[%s2256_s2 + $0x190] sm:$0xff] }
 0x5bb   : > { %vm1026_vm12 = vmor %vm1024_vm11, %vm1025_vm10  ;;  %1230 = vmatpush.msra.mxu0 %v1475_v24 }
 0x5bc   : > { %v1021_v29 = vsub.f32 1.0, %v1020_v28  ;;  %v1495_v28 = vld [vmem:[%s2256_s2 + $0x2e8] sm:$0xff] }
 0x5bd   : > { %1231 = vmatpush.msra.mxu0 %v1474_v2 }
 0x5be   : > { %v1022_v16 = vmul.f32 %v1575_v27, %v1021_v29  ;;  %v1494_v29 = vld [vmem:[%s2256_s2 + $0x2e0] sm:$0xff] }
 0x5bf   : > { %1232 = vmatpush.msra.mxu0 %v1473_v25 }
 0x5c0   : > { %v1023_v32 = vadd.f32 %v1575_v27, %v1022_v16  ;;  %v1492_v16 = vld [vmem:[%s2256_s2 + $0x2d0] sm:$0xff] }
 0x5c2   : > { %v1027_v34 = vsel %vm1026_vm12, %v1575_v27, %v1023_v32  ;;  %v1496_v27 = vld [vmem:[%s2256_s2 + $0x2f0] sm:$0xff]  ;;  %v1490_v32 = vld [vmem:[%s2256_s2 + $0x2c0] sm:$0xff] }
 0x5c3   : > { %v1032_v36 = vsel %vm1029_vm13, %v1031_v33, %v1027_v34  ;;  %1260 = vmatpush.msra.mxu1 %v1496_v27  ;;  %v1489_v33 = vld [vmem:[%s2256_s2 + $0x2b8] sm:$0xff]  ;;  %v1488_v34 = vld [vmem:[%s2256_s2 + $0x2b0] sm:$0xff] }
 0x5c4   : > { %v1033_v37 = vmul.f32 %v1573_v13, %v1032_v36  ;;  %v1517_v13 = vld [vmem:[%s2257_s3 + $0x190] ss:$0 sm:$0xff]  ;;  %v1487_v36 = vld [vmem:[%s2256_s2 + $0x2a8] sm:$0xff] }
 0x5c5   : > { %1261 = vmatpush.msra.mxu1 %v1495_v28 }
 0x5c6   : > { %1444 = vmatmul.msk.f32.vlgmr.msra.gmra.mxu2 %vm628_vm2, %v1033_v37  ;;  %v1486_v37 = vld [vmem:[%s2256_s2 + $0x2a0] sm:$0xff] }
 0x5c7   : > { %1143 = vmatpush.msra.mxu2 %v1458_v45  ;;  %1262 = vmatpush.msra.mxu1 %v1494_v29 }
 0x5c9   : > { %1144 = vmatpush.msra.mxu2 %v1457_v47  ;;  %1263 = vmatpush.msra.mxu1 %v1493_v30 }
 0x5cb   : > { %1145 = vmatpush.msra.mxu2 %v1456_v49  ;;  %1264 = vmatpush.msra.mxu1 %v1492_v16 }
 0x5cd   : > { %1146 = vmatpush.msra.mxu2 %v1455_v51  ;;  %1265 = vmatpush.msra.mxu1 %v1491_v31 }
 0x5cf   : > { %1147 = vmatpush.msra.mxu2 %v1454_v52  ;;  %1266 = vmatpush.msra.mxu1 %v1490_v32 }
 0x5d1   : > { %1148 = vmatpush.msra.mxu2 %v1453_v4  ;;  %1267 = vmatpush.msra.mxu1 %v1489_v33  ;;  %v1521_v4 = vld [vmem:[%s2257_s3 + $0x188] ss:$0 sm:$0xff] }
 0x5d3   : > { %1149 = vmatpush.msra.mxu2 %v1452_v53  ;;  %1268 = vmatpush.msra.mxu1 %v1488_v34 }
 0x5d5   : > { %1150 = vmatpush.msra.mxu2 %v1451_v48  ;;  %1269 = vmatpush.msra.mxu1 %v1487_v36 }
 0x5d7   : > { %1151 = vmatpush.msra.mxu2 %v1450_v35  ;;  %1270 = vmatpush.msra.mxu1 %v1486_v37 }
 0x5d9   : > { %1152 = vmatpush.msra.mxu2 %v1449_v44 }
 0x5db   : > { %1153 = vmatpush.msra.mxu2 %v1448_v50 }
 0x5dd   : > { %1154 = vmatpush.msra.mxu2 %v1447_v55 }
 0x649   : > { %v1054_v46 = vpop.f32.mrf.mxu2 }
 0x64a   : > { %v1058_v54 = vmul.f32 %v1054_v46, %v2006_v3 }
 0x64c   : > { %1445 = vmatmul.msk.f32.vlgmr.msra.gmra.mxu3 %vm222_vm0, %v1058_v54 }
 0x6cf   : > { %v2124_v0 = vpop.f32.mrf.mxu3 }
 0x6d0   : > { %1446 = vmatmul.msk.f32.vlgmr.msrb.gmra.mxu2 %vm1100_vm14, %v2124_v0 }
 0x6d8   : > { %1459 = vmatmul.msk.f32.vlgmr.msra.gmra.mxu2 %vm222_vm0, %v2006_v3  ;;  %v1462_v3 = vld [vmem:[%s2256_s2 + $0x130] sm:$0xff] }
 0x6d9   : > { %1191 = vmatpush.msrb.mxu3 %v1462_v3 }
 0x6db   : > { %1192 = vmatpush.msrb.mxu3 %v1461_v22 }
 0x6dd   : > { %1193 = vmatpush.msrb.mxu3 %v1460_v7 }
 0x753   : > { %v1121_v14 = vpop.f32.mrf.mxu2 }
 0x754   : > { %v1122_v15 = vadd.f32 %v1517_v13, %v1121_v14 }
 0x756   : > { %1276 = vrot.lane.b32.xlu1 %v1122_v15, %s1584_s8 }
 0x75b   : > { %v1156_v18 = vpop.f32.mrf.mxu2 }
 0x75c   : > { %v1157_v19 = vadd.f32 %v1518_v17, %v1156_v18 }
 0x75e   : > { %v1159_v20 = vmax.f32 %v1157_v19, 0.0 }
 0x760   : > { %1472 = vmatmul.msk.f32.vlgmr.msrb.gmra.mxu3 %vm222_vm0, %v1159_v20 }
 0x7c8   : > { %v1277_v47 = vpop.permute.xlu1 %1276 }
 0x7c9   : > { %v1286_v49 = vsel %vm1100_vm14, %v2124_v0, %v1277_v47 }
 0x7e3   : > { %v1195_v39 = vpop.f32.mrf.mxu3 }
 0x7e4   : > { %v1196_v40 = vadd.f32 %v1519_v38, %v1195_v39 }
 0x7e6   : > { %v1198_v41 = vmax.f32 %v1196_v40, 0.0 }
 0x7e8   : > { %1485 = vmatmul.msk.f32.vlgmr.msra.gmra.mxu0 %vm222_vm0, %v1198_v41 }
 0x865   : > { %v1234_v43 = vpop.f32.mrf.mxu0 }
 0x866   : > { %v1235_v45 = vadd.f32 %v1520_v42, %v1234_v43 }
 0x868   : > { %1498 = vmatmul.msk.f32.vlgmr.msra.gmra.mxu1 %vm222_vm0, %v1235_v45  ;;  %1279 = vrot.lane.b32.xlu1 %v1235_v45, %s1585_s28 }
 0x8da   : > { %v1280_v51 = vpop.permute.xlu1 %1279 }
 0x8db   : > { %v1288_v52 = vsel %vm1287_vm15, %v1286_v49, %v1280_v51 }
 0x8dc   : > { %1290 = vst [vmem:[%s199_s6] sm:$0xff] %v1288_v52 }
 0x8e5   : > { %v1272_v53 = vpop.f32.mrf.mxu1 }
 0x8e6   : > { %v1273_v46 = vadd.f32 %v1521_v4, %v1272_v53 }
 0x8e8   : > { %1283 = vrot.lane.b32.xlu2 %v1273_v46, %s1584_s8 }
 0x942   : > { %v1284_v54 = vpop.permute.xlu2 %1283 }
 0x943   : > { %v1289_v48 = vsel %vm1100_vm14, %v1280_v51, %v1284_v54 }
 0x944   : > { %1291 = vst [vmem:[%s199_s6 + $0x8] sm:$0xff] %v1289_v48 }
 0x945 PF: > { %s14_s15 = sadd.s32 1, %s1582_s15  }
 0x946   : > { %p11_p5 = scmp.ge.s32.totalorder %s14_s15, 4  }
 0x948   :  { %13 = sbr.rel (!%p11_p5) target bundleno = 1 (0x1), region = 73 }

</bundles_post_ra>
